<compile_context>
chip_gen: v6e
topology: v6e:2x2x1
jax: 0.10.0
libtpu: 0.0.40
codegen_flags: <defaults>
</compile_context>

<pallas_src>
import functools

import numpy as np
import jax
import jax.numpy as jnp
from jax import lax
from jax.experimental import pallas as pl
from jax.experimental.pallas import tpu as pltpu

# Conservative scoped-VMEM request: below v7x's 64 MiB physical VMEM, well
# below v5e/v6e's 128 MiB.  Toy shapes need < 1 MiB; this is headroom for
# production feature-map sizes.
_VMEM_LIMIT_BYTES = 48 * 1024 * 1024
_BTILE_BUDGET_BYTES = 12 * 1024 * 1024


def _relu6(x):
    return jnp.clip(x, 0.0, 6.0)


def _downsample_selection(H, W, Ho, Wo, stride, btile, dtype):
    """Block-diagonal (btile*H*W, btile*Ho*Wo) 0/1 selection matrix.

    Column p*Ho*Wo + (orow*Wo + ocol) picks full-res pixel
    (stride*orow, stride*ocol) of image p.  Built once on the host and passed
    to the kernel as a constant input, so the per-step cost is zero.
    """
    hw, howo = H * W, Ho * Wo
    sel = np.zeros((hw, howo), np.float32)
    for orow in range(Ho):
        for ocol in range(Wo):
            sel[stride * orow * W + stride * ocol, orow * Wo + ocol] = 1.0
    return jnp.asarray(np.kron(np.eye(btile, dtype=np.float32), sel), dtype)


def _pick_btile(B, HW, HoWo, Cin, hidden, oup, stride, mxu_itemsize,
                budget_bytes=_BTILE_BUDGET_BYTES):
    """Largest batch tile whose per-step footprint fits the VMEM budget and
    keeps both input and output blocks lane-dense (last dim % 128 == 0, or
    equal to the full array dim)."""
    def fits(d):
        act = 4 * d * (2 * Cin * HW + 2 * oup * HoWo + 4 * hidden * HW)
        sel = (d * HW) * (d * HoWo) * mxu_itemsize if stride > 1 else 0
        return act + sel <= budget_bytes

    def lane_dense(d):
        return (((d * HW) % 128 == 0) or d == B) and \
               (((d * HoWo) % 128 == 0) or d == B)

    cands = [d for d in range(1, B + 1)
             if B % d == 0 and fits(d) and lane_dense(d)]
    assert cands, "no valid batch tile: add spatial tiling or raise the budget"
    best = max(cands)
    # On v7x (2 TensorCores) keep >= 2 grid steps when the batch allows it so
    # the "parallel" batch axis gives both cores work.
    multi = [d for d in cands if B // d >= 2]
    if B >= 4 and multi:
        best = max(multi)
    return best


def inverted_residual_kernel(*refs, H, W, btile, stride, use_res, expand,
                             mxu_dtype):
    """One grid step = `btile` images, lane-concatenated, fully fused.

    Refs (in order):
      x      : (Cin, btile*H*W)          input, channel-major, lane-dense
      [w1    : (hidden, Cin)             expand 1x1 weights, BN1 scale folded
       b1    : (hidden, 1)               BN1 bias]           (only if expand)
      wdw    : (9, hidden, 1)            depthwise taps, BN2 scale folded
      b2     : (hidden, 1)               BN2 bias
      w3     : (oup, hidden)             project 1x1 weights, BN3 scale folded
      b3     : (oup, 1)                  BN3 bias
      [sel   : (btile*H*W, btile*Ho*Wo)  constant 0/1 downsample] (stride==2)
      o      : (oup, btile*Ho*Wo)        output, lane-dense
    """
    it = iter(refs)
    x_ref = next(it)
    if expand:
        w1_ref, b1_ref = next(it), next(it)
    wdw_ref, b2_ref = next(it), next(it)
    w3_ref, b3_ref = next(it), next(it)
    sel_ref = next(it) if stride > 1 else None
    o_ref = next(it)

    HW = H * W
    L = btile * HW
    x = x_ref[...]                                      # (Cin, L), lane-dense

    # ---- expand: 1x1 conv (MXU, N = btile*H*W lanes) + bias + ReLU6 --------
    if expand:
        h = jnp.dot(w1_ref[...], x.astype(mxu_dtype),
                    preferred_element_type=jnp.float32)
        h = _relu6(h + b1_ref[...])                     # (hidden, L)
    else:
        h = x                                           # hidden == Cin

    # ---- depthwise 3x3: 9 lane-rolls + boundary masks (f32 VPU path) -------
    # Masks are built once per step from per-image row/col (cheap shift/and:
    # H, W are powers of two).  They also kill the cross-image pollution that
    # rolling the lane-concatenated array would otherwise introduce.
    flat = lax.broadcasted_iota(jnp.int32, (1, L), 1)
    img = flat & (HW - 1)
    row = img >> (W.bit_length() - 1)
    col = img & (W - 1)
    row_ok = {-1: row >= 1, 0: None, 1: row < (H - 1)}
    col_ok = {-1: col >= 1, 0: None, 1: col < (W - 1)}
    wdw = wdw_ref[...]                                  # (9, hidden, 1)

    acc = h * wdw[4]                                    # centre tap, no mask
    for k in range(9):
        if k == 4:
            continue
        dh, dw = k // 3 - 1, k % 3 - 1
        s = dh * W + dw                                 # tap[:, f] == h[:, f+s]
        tap = pltpu.roll(h, (-s) % L, axis=1)
        rm, cm = row_ok[dh], col_ok[dw]
        mask = rm if cm is None else (cm if rm is None else rm & cm)
        acc = acc + jnp.where(mask, tap, 0.0) * wdw[k]

    # ---- stride-2: fold spatial downsample into an MXU matmul --------------
    # sel is a host-precomputed constant; N = btile*Ho*Wo lanes stays >= 128.
    # TODO(synk): for large stride-2 blocks, read strided taps directly and
    #             skip the full-res accumulation (4x fewer depthwise MACs).
    if stride > 1:
        acc = jnp.dot(acc.astype(mxu_dtype), sel_ref[...],
                      preferred_element_type=jnp.float32)

    acc = _relu6(acc + b2_ref[...])                     # (hidden, btile*Ho*Wo)

    # ---- project: 1x1 conv (MXU) + bias (no activation) --------------------
    out = jnp.dot(w3_ref[...], acc.astype(mxu_dtype),
                  preferred_element_type=jnp.float32)
    out = out + b3_ref[...]                             # (oup, btile*Ho*Wo)

    if use_res:
        out = out + x                                   # stride==1, Cin==oup

    o_ref[...] = out.astype(o_ref.dtype)


def inverted_residual(x_nchw, params, *, stride, expand_ratio,
                      mxu_dtype=jnp.bfloat16, btile=None):
    """NCHW in / NCHW out.  Only layout plumbing (reshape/transpose) and
    constant precomputation happen in the wrapper; all compute is fused in
    one pallas_call."""
    assert stride in (1, 2)
    B, Cin, H, W = x_nchw.shape
    assert (H & (H - 1)) == 0 and (W & (W - 1)) == 0, \
        "kernel assumes power-of-two H, W"  # TODO(synk): generalize row/col math
    hidden = params["wdw"].shape[-1]
    oup = params["w3"].shape[0]
    expand = expand_ratio != 1
    if not expand:
        assert hidden == Cin, "expand_ratio == 1 requires hidden == inp"
    Ho, Wo = (H - 1) // stride + 1, (W - 1) // stride + 1
    HW, HoWo = H * W, Ho * Wo
    use_res = (stride == 1) and (Cin == oup)

    mxu_itemsize = jnp.dtype(mxu_dtype).itemsize
    if btile is None:
        btile = _pick_btile(B, HW, HoWo, Cin, hidden, oup, stride, mxu_itemsize)
    assert B % btile == 0

    # Channel-major, images lane-concatenated: (Cin, B*H*W).
    x_cm = jnp.transpose(x_nchw.reshape(B, Cin, HW), (1, 0, 2)) \
              .reshape(Cin, B * HW)

    # Fold eval-mode BN scales into the conv weights; only biases go in-kernel.
    wdw_f = (params["wdw"] * params["s2"][:, 0]) \
        .reshape(9, hidden)[:, :, None].astype(jnp.float32)
    w3_f = (params["w3"] * params["s3"]).astype(mxu_dtype)

    inputs = [x_cm]
    in_specs = [pl.BlockSpec((Cin, btile * HW), lambda g: (0, g))]
    if expand:
        w1_f = (params["w1"] * params["s1"]).astype(mxu_dtype)
        inputs += [w1_f, params["b1"]]
        in_specs += [pl.BlockSpec(w1_f.shape, lambda g: (0, 0)),
                     pl.BlockSpec(params["b1"].shape, lambda g: (0, 0))]
    inputs += [wdw_f, params["b2"], w3_f, params["b3"]]
    in_specs += [pl.BlockSpec(wdw_f.shape, lambda g: (0, 0, 0)),
                 pl.BlockSpec(params["b2"].shape, lambda g: (0, 0)),
                 pl.BlockSpec(w3_f.shape, lambda g: (0, 0)),
                 pl.BlockSpec(params["b3"].shape, lambda g: (0, 0))]
    if stride > 1:
        sel = _downsample_selection(H, W, Ho, Wo, stride, btile, mxu_dtype)
        inputs.append(sel)
        in_specs.append(pl.BlockSpec(sel.shape, lambda g: (0, 0)))

    kernel = functools.partial(
        inverted_residual_kernel, H=H, W=W, btile=btile, stride=stride,
        use_res=use_res, expand=expand, mxu_dtype=mxu_dtype)

    out_cm = pl.pallas_call(
        kernel,
        out_shape=jax.ShapeDtypeStruct((oup, B * HoWo), x_nchw.dtype),
        grid=(B // btile,),
        in_specs=in_specs,
        out_specs=pl.BlockSpec((oup, btile * HoWo), lambda g: (0, g)),
        compiler_params=pltpu.CompilerParams(
            dimension_semantics=("parallel",),
            vmem_limit_bytes=_VMEM_LIMIT_BYTES),
    )(*inputs)

    # (oup, B*Ho*Wo) -> NCHW
    return jnp.transpose(out_cm.reshape(oup, B, Ho, Wo), (1, 0, 2, 3))


def init_params(key, inp, oup, expand_ratio):
    """Deterministic synthetic weights; BatchNorm folded (eval semantics)."""
    hidden = int(round(inp * expand_ratio))
    ks = jax.random.split(key, 16)

    def folded_bn(kg, kb, km, kv, c):
        gamma = 1.0 + 0.1 * jax.random.normal(kg, (c,), jnp.float32)
        beta = 0.1 * jax.random.normal(kb, (c,), jnp.float32)
        mean = 0.1 * jax.random.normal(km, (c,), jnp.float32)
        var = jnp.abs(jax.random.normal(kv, (c,), jnp.float32)) + 0.5
        scale = gamma / jnp.sqrt(var + 1e-5)
        bias = beta - mean * scale
        return scale.reshape(c, 1), bias.reshape(c, 1)

    w1 = 0.3 * jax.random.normal(ks[0], (hidden, inp), jnp.float32)
    s1, b1 = folded_bn(ks[1], ks[2], ks[3], ks[4], hidden)
    wdw = 0.3 * jax.random.normal(ks[5], (3, 3, hidden), jnp.float32)
    s2, b2 = folded_bn(ks[6], ks[7], ks[8], ks[9], hidden)
    w3 = 0.3 * jax.random.normal(ks[10], (oup, hidden), jnp.float32)
    s3, b3 = folded_bn(ks[11], ks[12], ks[13], ks[14], oup)
    return dict(w1=w1, s1=s1, b1=b1, wdw=wdw, s2=s2, b2=b2,
                w3=w3, s3=s3, b3=b3)


def ref_inverted_residual(x_nchw, params, *, stride, expand_ratio):
    """Pure-JAX reference (lax convs) for correctness checking."""
    x = jnp.transpose(x_nchw, (0, 2, 3, 1))          # NHWC
    inp = x.shape[-1]
    hidden = params["wdw"].shape[-1]
    dn = ("NHWC", "HWIO", "NHWC")
    h = x
    if expand_ratio != 1:
        w1 = jnp.transpose(params["w1"])[None, None]     # (1,1,inp,hidden)
        h = lax.conv_general_dilated(h, w1, (1, 1), "VALID",
                                     dimension_numbers=dn)
        h = jnp.clip(h * params["s1"][:, 0] + params["b1"][:, 0], 0.0, 6.0)
    wdw = params["wdw"][:, :, None, :]                   # (3,3,1,hidden)
    h = lax.conv_general_dilated(h, wdw, (stride, stride), ((1, 1), (1, 1)),
                                 dimension_numbers=dn,
                                 feature_group_count=hidden)
    h = jnp.clip(h * params["s2"][:, 0] + params["b2"][:, 0], 0.0, 6.0)
    w3 = jnp.transpose(params["w3"])[None, None]         # (1,1,hidden,oup)
    h = lax.conv_general_dilated(h, w3, (1, 1), "VALID", dimension_numbers=dn)
    h = h * params["s3"][:, 0] + params["b3"][:, 0]
    oup = params["w3"].shape[0]
    if stride == 1 and inp == oup:
        h = h + x
    return jnp.transpose(h, (0, 3, 1, 2))


if __name__ == "__main__":
    key = jax.random.PRNGKey(0)
    cases = [
        # (B, inp, oup, H, W, stride, expand_ratio)
        (2, 4, 4, 16, 16, 1, 6),   # residual path (stride 1, inp == oup)
        (2, 4, 8, 16, 16, 2, 6),   # stride-2; btile=2 keeps the store lane-dense
        (2, 8, 8, 16, 16, 1, 1),   # expand_ratio == 1 (no expand conv)
    ]
    # f32 MXU feed is checked tight; bf16 MXU feed (v6e/v7x fast path) is
    # checked against the same f32 reference at a bf16-appropriate tolerance.
    modes = [(jnp.float32, 2e-3, 2e-3), (jnp.bfloat16, 1e-1, 5e-2)]
    for idx, (B, inp, oup, H, W, stride, er) in enumerate(cases):
        key, kx, kp = jax.random.split(key, 3)
        x = jax.random.normal(kx, (B, inp, H, W), jnp.float32)  # NCHW
        params = init_params(kp, inp, oup, er)
        ref = ref_inverted_residual(x, params, stride=stride, expand_ratio=er)
        for mxu_dtype, atol, rtol in modes:
            out = jax.block_until_ready(
                inverted_residual(x, params, stride=stride, expand_ratio=er,
                                  mxu_dtype=mxu_dtype))
            assert out.shape == ref.shape, (idx, out.shape, ref.shape)
            err = float(jnp.max(jnp.abs(out - ref)))
            assert jnp.allclose(out, ref, atol=atol, rtol=rtol), \
                (idx, str(jnp.dtype(mxu_dtype)), err)
    print("KERNEL_OK")
</pallas_src>

<mosaic_0001>
module attributes {stable_mosaic.version = 11 : i64} {
  func.func @inverted_residual_kernel(%arg0: i32, %arg1: memref<4x512xf32, #tpu.memory_space<vmem>>, %arg2: memref<24x4xf32, #tpu.memory_space<vmem>>, %arg3: memref<24x1xf32, #tpu.memory_space<vmem>>, %arg4: memref<9x24x1xf32, #tpu.memory_space<vmem>>, %arg5: memref<24x1xf32, #tpu.memory_space<vmem>>, %arg6: memref<4x24xf32, #tpu.memory_space<vmem>>, %arg7: memref<4x1xf32, #tpu.memory_space<vmem>>, %arg8: memref<4x512xf32, #tpu.memory_space<vmem>>) attributes {dimension_semantics = [#tpu.dimension_semantics<parallel>], iteration_bounds = array<i64: 1>, scalar_prefetch = 0 : i64, scratch_operands = 0 : i64, tpu.core_type = #tpu.core_type<tc>, window_params = [{transform_indices = @transform_0, window_bounds = array<i64: 4, 512>}, {pipeline_mode = #tpu.pipeline_mode<synchronous>, transform_indices = @transform_1, window_bounds = array<i64: 24, 4>}, {pipeline_mode = #tpu.pipeline_mode<synchronous>, transform_indices = @transform_2, window_bounds = array<i64: 24, 1>}, {pipeline_mode = #tpu.pipeline_mode<synchronous>, transform_indices = @transform_3, window_bounds = array<i64: 9, 24, 1>}, {pipeline_mode = #tpu.pipeline_mode<synchronous>, transform_indices = @transform_4, window_bounds = array<i64: 24, 1>}, {pipeline_mode = #tpu.pipeline_mode<synchronous>, transform_indices = @transform_5, window_bounds = array<i64: 4, 24>}, {pipeline_mode = #tpu.pipeline_mode<synchronous>, transform_indices = @transform_6, window_bounds = array<i64: 4, 1>}, {transform_indices = @transform_7, window_bounds = array<i64: 4, 512>}]} {
    %c0 = arith.constant 0 : index
    %c0_0 = arith.constant 0 : index
    %0 = vector.load %arg1[%c0, %c0_0] : memref<4x512xf32, #tpu.memory_space<vmem>>, vector<4x512xf32>
    %c0_1 = arith.constant 0 : index
    %c0_2 = arith.constant 0 : index
    %1 = vector.load %arg2[%c0_1, %c0_2] : memref<24x4xf32, #tpu.memory_space<vmem>>, vector<24x4xf32>
    %cst = arith.constant dense<0.000000e+00> : vector<24x512xf32>
    %2 = tpu.matmul %1, %0, %cst {dimension_numbers = #tpu.dot_dimension_numbers<[1], [0], [0], [1], [0, 0, 1, 1], [], []>} : vector<24x4xf32>, vector<4x512xf32>, vector<24x512xf32> -> vector<24x512xf32>
    %c0_3 = arith.constant 0 : index
    %c0_4 = arith.constant 0 : index
    %3 = vector.load %arg3[%c0_3, %c0_4] : memref<24x1xf32, #tpu.memory_space<vmem>>, vector<24x1xf32>
    %4 = vector.broadcast %3 : vector<24x1xf32> to vector<24x512xf32>
    %5 = arith.addf %2, %4 : vector<24x512xf32>
    %cst_5 = arith.constant 0.000000e+00 : f32
    %cst_6 = arith.constant 6.000000e+00 : f32
    %6 = vector.broadcast %cst_5 : f32 to vector<24x512xf32>
    %7 = arith.maximumf %6, %5 : vector<24x512xf32>
    %8 = vector.broadcast %cst_6 : f32 to vector<24x512xf32>
    %9 = arith.minimumf %8, %7 : vector<24x512xf32>
    %10 = tpu.iota {dimensions = array<i32: 1>} : vector<1x512xi32>
    %c255_i32 = arith.constant 255 : i32
    %11 = vector.broadcast %c255_i32 : i32 to vector<1x512xi32>
    %12 = arith.andi %10, %11 : vector<1x512xi32>
    %c4_i32 = arith.constant 4 : i32
    %13 = vector.broadcast %c4_i32 : i32 to vector<1x512xi32>
    %14 = arith.shrsi %12, %13 : vector<1x512xi32>
    %c15_i32 = arith.constant 15 : i32
    %15 = vector.broadcast %c15_i32 : i32 to vector<1x512xi32>
    %16 = arith.andi %12, %15 : vector<1x512xi32>
    %c1_i32 = arith.constant 1 : i32
    %17 = vector.broadcast %c1_i32 : i32 to vector<1x512xi32>
    %18 = arith.cmpi sge, %14, %17 : vector<1x512xi32>
    %c15_i32_7 = arith.constant 15 : i32
    %19 = vector.broadcast %c15_i32_7 : i32 to vector<1x512xi32>
    %20 = arith.cmpi slt, %14, %19 : vector<1x512xi32>
    %c1_i32_8 = arith.constant 1 : i32
    %21 = vector.broadcast %c1_i32_8 : i32 to vector<1x512xi32>
    %22 = arith.cmpi sge, %16, %21 : vector<1x512xi32>
    %c15_i32_9 = arith.constant 15 : i32
    %23 = vector.broadcast %c15_i32_9 : i32 to vector<1x512xi32>
    %24 = arith.cmpi slt, %16, %23 : vector<1x512xi32>
    %c0_10 = arith.constant 0 : index
    %c0_11 = arith.constant 0 : index
    %c0_12 = arith.constant 0 : index
    %25 = vector.load %arg4[%c0_10, %c0_11, %c0_12] : memref<9x24x1xf32, #tpu.memory_space<vmem>>, vector<9x24x1xf32>
    %26 = vector.extract_strided_slice %25 {offsets = [4, 0, 0], sizes = [1, 24, 1], strides = [1, 1, 1]} : vector<9x24x1xf32> to vector<1x24x1xf32>
    %27 = vector.shape_cast %26 : vector<1x24x1xf32> to vector<24x1xf32>
    %28 = vector.broadcast %27 : vector<24x1xf32> to vector<24x512xf32>
    %29 = arith.mulf %9, %28 : vector<24x512xf32>
    %c17_i32 = arith.constant 17 : i32
    %30 = tpu.dynamic_rotate %9 by %c17_i32 dim 1 : vector<24x512xf32>, i32 -> vector<24x512xf32>
    %31 = arith.andi %18, %22 : vector<1x512xi1>
    %cst_13 = arith.constant 0.000000e+00 : f32
    %32 = vector.shape_cast %31 : vector<1x512xi1> to vector<1x512xi1>
    %33 = vector.broadcast %32 : vector<1x512xi1> to vector<24x512xi1>
    %34 = vector.broadcast %cst_13 : f32 to vector<24x512xf32>
    %35 = arith.select %33, %30, %34 : vector<24x512xi1>, vector<24x512xf32>
    %36 = vector.extract_strided_slice %25 {offsets = [0, 0, 0], sizes = [1, 24, 1], strides = [1, 1, 1]} : vector<9x24x1xf32> to vector<1x24x1xf32>
    %37 = vector.shape_cast %36 : vector<1x24x1xf32> to vector<24x1xf32>
    %38 = vector.broadcast %37 : vector<24x1xf32> to vector<24x512xf32>
    %39 = arith.mulf %35, %38 : vector<24x512xf32>
    %40 = arith.addf %29, %39 : vector<24x512xf32>
    %c16_i32 = arith.constant 16 : i32
    %41 = tpu.dynamic_rotate %9 by %c16_i32 dim 1 : vector<24x512xf32>, i32 -> vector<24x512xf32>
    %cst_14 = arith.constant 0.000000e+00 : f32
    %42 = vector.shape_cast %18 : vector<1x512xi1> to vector<1x512xi1>
    %43 = vector.broadcast %42 : vector<1x512xi1> to vector<24x512xi1>
    %44 = vector.broadcast %cst_14 : f32 to vector<24x512xf32>
    %45 = arith.select %43, %41, %44 : vector<24x512xi1>, vector<24x512xf32>
    %46 = vector.extract_strided_slice %25 {offsets = [1, 0, 0], sizes = [1, 24, 1], strides = [1, 1, 1]} : vector<9x24x1xf32> to vector<1x24x1xf32>
    %47 = vector.shape_cast %46 : vector<1x24x1xf32> to vector<24x1xf32>
    %48 = vector.broadcast %47 : vector<24x1xf32> to vector<24x512xf32>
    %49 = arith.mulf %45, %48 : vector<24x512xf32>
    %50 = arith.addf %40, %49 : vector<24x512xf32>
    %c15_i32_15 = arith.constant 15 : i32
    %51 = tpu.dynamic_rotate %9 by %c15_i32_15 dim 1 : vector<24x512xf32>, i32 -> vector<24x512xf32>
    %52 = arith.andi %18, %24 : vector<1x512xi1>
    %cst_16 = arith.constant 0.000000e+00 : f32
    %53 = vector.shape_cast %52 : vector<1x512xi1> to vector<1x512xi1>
    %54 = vector.broadcast %53 : vector<1x512xi1> to vector<24x512xi1>
    %55 = vector.broadcast %cst_16 : f32 to vector<24x512xf32>
    %56 = arith.select %54, %51, %55 : vector<24x512xi1>, vector<24x512xf32>
    %57 = vector.extract_strided_slice %25 {offsets = [2, 0, 0], sizes = [1, 24, 1], strides = [1, 1, 1]} : vector<9x24x1xf32> to vector<1x24x1xf32>
    %58 = vector.shape_cast %57 : vector<1x24x1xf32> to vector<24x1xf32>
    %59 = vector.broadcast %58 : vector<24x1xf32> to vector<24x512xf32>
    %60 = arith.mulf %56, %59 : vector<24x512xf32>
    %61 = arith.addf %50, %60 : vector<24x512xf32>
    %c1_i32_17 = arith.constant 1 : i32
    %62 = tpu.dynamic_rotate %9 by %c1_i32_17 dim 1 : vector<24x512xf32>, i32 -> vector<24x512xf32>
    %cst_18 = arith.constant 0.000000e+00 : f32
    %63 = vector.shape_cast %22 : vector<1x512xi1> to vector<1x512xi1>
    %64 = vector.broadcast %63 : vector<1x512xi1> to vector<24x512xi1>
    %65 = vector.broadcast %cst_18 : f32 to vector<24x512xf32>
    %66 = arith.select %64, %62, %65 : vector<24x512xi1>, vector<24x512xf32>
    %67 = vector.extract_strided_slice %25 {offsets = [3, 0, 0], sizes = [1, 24, 1], strides = [1, 1, 1]} : vector<9x24x1xf32> to vector<1x24x1xf32>
    %68 = vector.shape_cast %67 : vector<1x24x1xf32> to vector<24x1xf32>
    %69 = vector.broadcast %68 : vector<24x1xf32> to vector<24x512xf32>
    %70 = arith.mulf %66, %69 : vector<24x512xf32>
    %71 = arith.addf %61, %70 : vector<24x512xf32>
    %c511_i32 = arith.constant 511 : i32
    %72 = tpu.dynamic_rotate %9 by %c511_i32 dim 1 : vector<24x512xf32>, i32 -> vector<24x512xf32>
    %cst_19 = arith.constant 0.000000e+00 : f32
    %73 = vector.shape_cast %24 : vector<1x512xi1> to vector<1x512xi1>
    %74 = vector.broadcast %73 : vector<1x512xi1> to vector<24x512xi1>
    %75 = vector.broadcast %cst_19 : f32 to vector<24x512xf32>
    %76 = arith.select %74, %72, %75 : vector<24x512xi1>, vector<24x512xf32>
    %77 = vector.extract_strided_slice %25 {offsets = [5, 0, 0], sizes = [1, 24, 1], strides = [1, 1, 1]} : vector<9x24x1xf32> to vector<1x24x1xf32>
    %78 = vector.shape_cast %77 : vector<1x24x1xf32> to vector<24x1xf32>
    %79 = vector.broadcast %78 : vector<24x1xf32> to vector<24x512xf32>
    %80 = arith.mulf %76, %79 : vector<24x512xf32>
    %81 = arith.addf %71, %80 : vector<24x512xf32>
    %c497_i32 = arith.constant 497 : i32
    %82 = tpu.dynamic_rotate %9 by %c497_i32 dim 1 : vector<24x512xf32>, i32 -> vector<24x512xf32>
    %83 = arith.andi %20, %22 : vector<1x512xi1>
    %cst_20 = arith.constant 0.000000e+00 : f32
    %84 = vector.shape_cast %83 : vector<1x512xi1> to vector<1x512xi1>
    %85 = vector.broadcast %84 : vector<1x512xi1> to vector<24x512xi1>
    %86 = vector.broadcast %cst_20 : f32 to vector<24x512xf32>
    %87 = arith.select %85, %82, %86 : vector<24x512xi1>, vector<24x512xf32>
    %88 = vector.extract_strided_slice %25 {offsets = [6, 0, 0], sizes = [1, 24, 1], strides = [1, 1, 1]} : vector<9x24x1xf32> to vector<1x24x1xf32>
    %89 = vector.shape_cast %88 : vector<1x24x1xf32> to vector<24x1xf32>
    %90 = vector.broadcast %89 : vector<24x1xf32> to vector<24x512xf32>
    %91 = arith.mulf %87, %90 : vector<24x512xf32>
    %92 = arith.addf %81, %91 : vector<24x512xf32>
    %c496_i32 = arith.constant 496 : i32
    %93 = tpu.dynamic_rotate %9 by %c496_i32 dim 1 : vector<24x512xf32>, i32 -> vector<24x512xf32>
    %cst_21 = arith.constant 0.000000e+00 : f32
    %94 = vector.shape_cast %20 : vector<1x512xi1> to vector<1x512xi1>
    %95 = vector.broadcast %94 : vector<1x512xi1> to vector<24x512xi1>
    %96 = vector.broadcast %cst_21 : f32 to vector<24x512xf32>
    %97 = arith.select %95, %93, %96 : vector<24x512xi1>, vector<24x512xf32>
    %98 = vector.extract_strided_slice %25 {offsets = [7, 0, 0], sizes = [1, 24, 1], strides = [1, 1, 1]} : vector<9x24x1xf32> to vector<1x24x1xf32>
    %99 = vector.shape_cast %98 : vector<1x24x1xf32> to vector<24x1xf32>
    %100 = vector.broadcast %99 : vector<24x1xf32> to vector<24x512xf32>
    %101 = arith.mulf %97, %100 : vector<24x512xf32>
    %102 = arith.addf %92, %101 : vector<24x512xf32>
    %c495_i32 = arith.constant 495 : i32
    %103 = tpu.dynamic_rotate %9 by %c495_i32 dim 1 : vector<24x512xf32>, i32 -> vector<24x512xf32>
    %104 = arith.andi %20, %24 : vector<1x512xi1>
    %cst_22 = arith.constant 0.000000e+00 : f32
    %105 = vector.shape_cast %104 : vector<1x512xi1> to vector<1x512xi1>
    %106 = vector.broadcast %105 : vector<1x512xi1> to vector<24x512xi1>
    %107 = vector.broadcast %cst_22 : f32 to vector<24x512xf32>
    %108 = arith.select %106, %103, %107 : vector<24x512xi1>, vector<24x512xf32>
    %109 = vector.extract_strided_slice %25 {offsets = [8, 0, 0], sizes = [1, 24, 1], strides = [1, 1, 1]} : vector<9x24x1xf32> to vector<1x24x1xf32>
    %110 = vector.shape_cast %109 : vector<1x24x1xf32> to vector<24x1xf32>
    %111 = vector.broadcast %110 : vector<24x1xf32> to vector<24x512xf32>
    %112 = arith.mulf %108, %111 : vector<24x512xf32>
    %113 = arith.addf %102, %112 : vector<24x512xf32>
    %c0_23 = arith.constant 0 : index
    %c0_24 = arith.constant 0 : index
    %114 = vector.load %arg5[%c0_23, %c0_24] : memref<24x1xf32, #tpu.memory_space<vmem>>, vector<24x1xf32>
    %115 = vector.broadcast %114 : vector<24x1xf32> to vector<24x512xf32>
    %116 = arith.addf %113, %115 : vector<24x512xf32>
    %cst_25 = arith.constant 0.000000e+00 : f32
    %cst_26 = arith.constant 6.000000e+00 : f32
    %117 = vector.broadcast %cst_25 : f32 to vector<24x512xf32>
    %118 = arith.maximumf %117, %116 : vector<24x512xf32>
    %119 = vector.broadcast %cst_26 : f32 to vector<24x512xf32>
    %120 = arith.minimumf %119, %118 : vector<24x512xf32>
    %c0_27 = arith.constant 0 : index
    %c0_28 = arith.constant 0 : index
    %121 = vector.load %arg6[%c0_27, %c0_28] : memref<4x24xf32, #tpu.memory_space<vmem>>, vector<4x24xf32>
    %cst_29 = arith.constant dense<0.000000e+00> : vector<4x512xf32>
    %122 = tpu.matmul %121, %120, %cst_29 {dimension_numbers = #tpu.dot_dimension_numbers<[1], [0], [0], [1], [0, 0, 1, 1], [], []>} : vector<4x24xf32>, vector<24x512xf32>, vector<4x512xf32> -> vector<4x512xf32>
    %c0_30 = arith.constant 0 : index
    %c0_31 = arith.constant 0 : index
    %123 = vector.load %arg7[%c0_30, %c0_31] : memref<4x1xf32, #tpu.memory_space<vmem>>, vector<4x1xf32>
    %124 = vector.broadcast %123 : vector<4x1xf32> to vector<4x512xf32>
    %125 = arith.addf %122, %124 : vector<4x512xf32>
    %126 = arith.addf %125, %0 : vector<4x512xf32>
    %c0_32 = arith.constant 0 : index
    %c0_33 = arith.constant 0 : index
    %127 = vector.load %arg8[%c0_32, %c0_33] : memref<4x512xf32, #tpu.memory_space<vmem>>, vector<4x512xf32>
    tpu.vector_store %arg8[%c0_32, %c0_33], %126 {strides = array<i32>} : memref<4x512xf32, #tpu.memory_space<vmem>>, vector<4x512xf32>,
    return
  }
  func.func @transform_0(%arg0: i32) -> (i32, i32) {
    %c0_i32 = arith.constant 0 : i32
    %c0_i32_0 = arith.constant 0 : i32
    return %c0_i32, %arg0 : i32, i32
  }
  func.func @transform_1(%arg0: i32) -> (i32, i32) {
    %c0_i32 = arith.constant 0 : i32
    %c0_i32_0 = arith.constant 0 : i32
    %c0_i32_1 = arith.constant 0 : i32
    return %c0_i32, %c0_i32_0 : i32, i32
  }
  func.func @transform_2(%arg0: i32) -> (i32, i32) {
    %c0_i32 = arith.constant 0 : i32
    %c0_i32_0 = arith.constant 0 : i32
    %c0_i32_1 = arith.constant 0 : i32
    return %c0_i32, %c0_i32_0 : i32, i32
  }
  func.func @transform_3(%arg0: i32) -> (i32, i32, i32) {
    %c0_i32 = arith.constant 0 : i32
    %c0_i32_0 = arith.constant 0 : i32
    %c0_i32_1 = arith.constant 0 : i32
    %c0_i32_2 = arith.constant 0 : i32
    return %c0_i32, %c0_i32_0, %c0_i32_1 : i32, i32, i32
  }
  func.func @transform_4(%arg0: i32) -> (i32, i32) {
    %c0_i32 = arith.constant 0 : i32
    %c0_i32_0 = arith.constant 0 : i32
    %c0_i32_1 = arith.constant 0 : i32
    return %c0_i32, %c0_i32_0 : i32, i32
  }
  func.func @transform_5(%arg0: i32) -> (i32, i32) {
    %c0_i32 = arith.constant 0 : i32
    %c0_i32_0 = arith.constant 0 : i32
    %c0_i32_1 = arith.constant 0 : i32
    return %c0_i32, %c0_i32_0 : i32, i32
  }
  func.func @transform_6(%arg0: i32) -> (i32, i32) {
    %c0_i32 = arith.constant 0 : i32
    %c0_i32_0 = arith.constant 0 : i32
    %c0_i32_1 = arith.constant 0 : i32
    return %c0_i32, %c0_i32_0 : i32, i32
  }
  func.func @transform_7(%arg0: i32) -> (i32, i32) {
    %c0_i32 = arith.constant 0 : i32
    %c0_i32_0 = arith.constant 0 : i32
    return %c0_i32, %arg0 : i32, i32
  }
}

</mosaic_0001>

<bundles_post_ra>
// kernel: tpu_custom_call.1
= control target key start
LH: loop header
LB: loop body
LE: loop exit
PB: predicated region body
PF: predicated region fallthrough
CT: control target
= control target key end

     0   :  { %vm64_vm0 = vcmask 1043456   ;;  %v1422_v4 = vmov 0.0   ;;  %vm54_vm1 = vcmask 31744   ;;  %v1423_v6 = vmov 0   ;;  %s2718_s0 = inlined_call_operand.vmem [shape: f32[4,512], index: 0, kind: input, shape index: {}]   ;;  %s2719_s1 = inlined_call_operand.vmem [shape: f32[24,4], index: 1, kind: input, shape index: {}]   ;;  %s2720_s2 = inlined_call_operand.vmem [shape: f32[24,1], index: 2, kind: input, shape index: {}]   ;;  %s2721_s3 = inlined_call_operand.vmem [shape: f32[9,24,1], index: 3, kind: input, shape index: {}]   ;;  %s2722_s4 = inlined_call_operand.vmem [shape: f32[24,1], index: 4, kind: input, shape index: {}]   ;;  %s2723_s5 = inlined_call_operand.vmem [shape: f32[4,24], index: 5, kind: input, shape index: {}]   ;;  %s2724_s6 = inlined_call_operand.vmem [shape: f32[4,1], index: 6, kind: input, shape index: {}]   ;;  %s2725_s7 = inlined_call_operand.hbm [shape: f32[4,512], index: 7, kind: output, shape index: {}]  }
   0x1   :  { %v27_v0 = vld [vmem:[%s2718_s0] sm:$0xff]  ;;  %v28_v1 = vld [vmem:[%s2718_s0 + $0x8] sm:$0xff]  ;;  %137 = vmatprep.mubr.f32.mxu0 %v1422_v4  ;;  %220 = vmatprep.mubr.f32.mxu1 %v1422_v4  ;;  %v34_v8 = vld [vmem:[%s2720_s2 + $0x10] sm:$0xff] }
   0x2   :  { %v1479_v2 = vcombine.high %v27_v0, %v27_v0  ;;  %v1481_v3 = vcombine.high %v28_v1, %v28_v1  ;;  %v29_v5 = vld [vmem:[%s2719_s1] sm:$0xff]  ;;  %1395 = vset.pattern.permute.xlu1 %v1423_v6  ;;  %1394 = vset.pattern.permute.xlu0 %v1423_v6  ;;  %v30_v9 = vld [vmem:[%s2719_s1 + $0x8] sm:$0xff]  ;;  %v31_v12 = vld [vmem:[%s2719_s1 + $0x10] sm:$0xff] }
   0x3   :  { %v32_v7 = vld [vmem:[%s2720_s2] sm:$0xff]  ;;  %47 = vperm.xlu0 %1394, %v34_v8   ;;  %v33_v11 = vld [vmem:[%s2720_s2 + $0x8] sm:$0xff] }
   0x4   :  { %2780 = vst [vmem:[#allocation5_spill] sm:$0xff] %v1479_v2  ;;  %2781 = vst [vmem:[#allocation6_spill] sm:$0xff] %v1481_v3  ;;  %1371 = vmatprep.subr.msk.mxu0 %vm64_vm0, %v1479_v2  ;;  %1376 = vmatprep.subr.msk.mxu1 %vm64_vm0, %v1481_v3  ;;  %v308_v10 = vld [vmem:[%s2721_s3 + $0x60] sm:$0xff] }
   0x5   :  { %1372 = vmatpush1.msk.msra.mxu0 %vm64_vm0, %v27_v0  ;;  %1377 = vmatpush1.msk.msra.mxu1 %vm64_vm0, %v28_v1 }
   0x6   :  { %1373 = vmatmul.mubr.msk.f32.vlgmr.msra.gmra.mxu0 %vm54_vm1, %v29_v5  ;;  %1378 = vmatmul.mubr.msk.f32.vlgmr.msra.gmra.mxu1 %vm54_vm1, %v29_v5 }
   0x7   :  { %143 = vmatprep.mubr.f32.mxu0 %v1422_v4  ;;  %226 = vmatprep.mubr.f32.mxu1 %v1422_v4 }
   0x8   :  { %37 = vperm.xlu1 %1395, %v32_v7   ;;  %42 = vperm.xlu0 %1394, %v33_v11  }
   0xa   :  { %1374 = vmatmul.mubr.msk.f32.gmra.mxu0 %vm54_vm1, %v30_v9  ;;  %1379 = vmatmul.mubr.msk.f32.gmra.mxu1 %vm54_vm1, %v30_v9 }
   0xb   :  { %149 = vmatprep.mubr.f32.mxu0 %v1422_v4  ;;  %232 = vmatprep.mubr.f32.mxu1 %v1422_v4 }
   0xc   :  { %325 = vperm.xlu1 %1395, %v308_v10  }
   0xd   :  { %12 = vsyncpa [#allocation3], 0  ;;  %v310_v13 = vld [vmem:[%s2721_s3 + $0x70] sm:$0xff]  ;;  %v309_v14 = vld [vmem:[%s2721_s3 + $0x68] sm:$0xff]  ;;  %s1424_s19 = smov 17   ;;  %s1425_s20 = smov 15  }
   0xe   :  { %1375 = vmatmul.mubr.msk.f32.gmra.mxu0 %vm54_vm1, %v31_v12  ;;  %1380 = vmatmul.mubr.msk.f32.gmra.mxu1 %vm54_vm1, %v31_v12  ;;  %v298_v15 = vld [vmem:[%s2721_s3 + $0x10] sm:$0xff]  ;;  %v297_v16 = vld [vmem:[%s2721_s3 + $0x8] sm:$0xff]  ;;  %v300_v18 = vld [vmem:[%s2721_s3 + $0x20] sm:$0xff]  ;;  %s1426_s21 = smov 16   ;;  %s1427_s22 = smov 127  }
   0xf   :  { %1334 = vmatprep.mubr.f32.mxu1 %v1422_v4  ;;  %1263 = vmatprep.mubr.f32.mxu0 %v1422_v4  ;;  %v301_v17 = vld [vmem:[%s2721_s3 + $0x28] sm:$0xff]  ;;  %v296_v19 = vld [vmem:[%s2721_s3] sm:$0xff]  ;;  %v299_v20 = vld [vmem:[%s2721_s3 + $0x18] sm:$0xff]  ;;  %s1428_s1 = smov 1   ;;  %s1429_s2 = smov 113  }
  0x10   :  { %335 = vperm.xlu1 %1395, %v310_v13   ;;  %330 = vperm.xlu0 %1394, %v309_v14   ;;  %v304_v21 = vld [vmem:[%s2721_s3 + $0x40] sm:$0xff]  ;;  %v307_v22 = vld [vmem:[%s2721_s3 + $0x58] sm:$0xff]  ;;  %v306_v24 = vld [vmem:[%s2721_s3 + $0x50] sm:$0xff]  ;;  %s1430_s23 = smov 112   ;;  %s1431_s24 = smov 111  }
  0x11   :  { %v303_v23 = vld [vmem:[%s2721_s3 + $0x38] sm:$0xff]  ;;  %v302_v25 = vld [vmem:[%s2721_s3 + $0x30] sm:$0xff]  ;;  %v305_v26 = vld [vmem:[%s2721_s3 + $0x48] sm:$0xff] }
  0x12   :  { %v313_v27 = vld [vmem:[%s2721_s3 + $0x88] sm:$0xff]  ;;  %v316_v28 = vld [vmem:[%s2721_s3 + $0xa0] sm:$0xff]  ;;  %v315_v30 = vld [vmem:[%s2721_s3 + $0x98] sm:$0xff] }
  0x13   :  { %v312_v29 = vld [vmem:[%s2721_s3 + $0x80] sm:$0xff]  ;;  %v311_v31 = vld [vmem:[%s2721_s3 + $0x78] sm:$0xff]  ;;  %v314_v32 = vld [vmem:[%s2721_s3 + $0x90] sm:$0xff] }
  0x14   :  { %423 = vperm.xlu1 %1395, %v298_v15   ;;  %418 = vperm.xlu0 %1394, %v297_v16   ;;  %v319_v33 = vld [vmem:[%s2721_s3 + $0xb8] sm:$0xff]  ;;  %v322_v34 = vld [vmem:[%s2721_s3 + $0xd0] sm:$0xff]  ;;  %v321_v36 = vld [vmem:[%s2721_s3 + $0xc8] sm:$0xff] }
  0x15   :  { %v318_v35 = vld [vmem:[%s2721_s3 + $0xb0] sm:$0xff]  ;;  %v317_v37 = vld [vmem:[%s2721_s3 + $0xa8] sm:$0xff] }
  0x18   :  { %519 = vperm.xlu1 %1395, %v301_v17   ;;  %514 = vperm.xlu0 %1394, %v300_v18  }
  0x1c   :  { %413 = vperm.xlu1 %1395, %v296_v19   ;;  %509 = vperm.xlu0 %1394, %v299_v20  }
  0x20   :  { %619 = vperm.xlu1 %1395, %v304_v21   ;;  %715 = vperm.xlu0 %1394, %v307_v22  }
  0x24   :  { %614 = vperm.xlu1 %1395, %v303_v23   ;;  %710 = vperm.xlu0 %1394, %v306_v24  }
  0x28   :  { %609 = vperm.xlu1 %1395, %v302_v25   ;;  %705 = vperm.xlu0 %1394, %v305_v26  }
  0x2c   :  { %811 = vperm.xlu1 %1395, %v313_v27   ;;  %911 = vperm.xlu0 %1394, %v316_v28  }
  0x30   :  { %806 = vperm.xlu1 %1395, %v312_v29   ;;  %906 = vperm.xlu0 %1394, %v315_v30  }
  0x34   :  { %801 = vperm.xlu1 %1395, %v311_v31   ;;  %901 = vperm.xlu0 %1394, %v314_v32  }
  0x38   :  { %1007 = vperm.xlu1 %1395, %v319_v33   ;;  %1107 = vperm.xlu0 %1394, %v322_v34  }
  0x3c   :  { %1002 = vperm.xlu1 %1395, %v318_v35   ;;  %1102 = vperm.xlu0 %1394, %v321_v36  }
  0x40   :  { %997 = vperm.xlu1 %1395, %v317_v37  }
  0x7e   :  { %v1627_v55 = vpop.permute.xlu0 %47 }
  0x83   :  { %v38_v38 = vpop.permute.xlu1 %37  ;;  %v43_v57 = vpop.permute.xlu0 %42 }
  0x87   :  { %v1629_v56 = vpop.permute.xlu1 %325 }
  0x8b   :  { %v1639_v60 = vpop.permute.xlu1 %335  ;;  %v1647_v4 = vpop.permute.xlu0 %330 }
  0x8c   :  { %2782 = vst [vmem:[#allocation7_spill] sm:$0xff] %v1639_v60 }
  0x8f   :  { %v1645_v1 = vpop.permute.xlu1 %423  ;;  %v1663_v8 = vpop.permute.xlu0 %418 }
  0x90   :  { %2783 = vst [vmem:[#allocation8_spill] sm:$0xff] %v1645_v1 }
  0x93   :  { %v1661_v7 = vpop.permute.xlu1 %519  ;;  %v1671_v10 = vpop.permute.xlu0 %514 }
  0x94   :  { %2784 = vst [vmem:[#allocation9_spill] sm:$0xff] %v1661_v7  ;;  %2785 = vst [vmem:[#allocation10_spill] sm:$0xff] %v1671_v10 }
  0x97   :  { %v1669_v9 = vpop.permute.xlu1 %413  ;;  %v1683_v15 = vpop.permute.xlu0 %509 }
  0x9b   :  { %v1681_v13 = vpop.permute.xlu1 %619  ;;  %v1693_v20 = vpop.permute.xlu0 %715 }
  0x9c   :  { %2786 = vst [vmem:[#allocation11_spill] sm:$0xff] %v1681_v13  ;;  %2788 = vst [vmem:[#allocation13_spill] sm:$0xff] %v1693_v20 }
  0x9f   :  { %v1691_v19 = vpop.permute.xlu1 %614  ;;  %v1707_v24 = vpop.permute.xlu0 %710 }
  0xa0   :  { %2787 = vst [vmem:[#allocation12_spill] sm:$0xff] %v1691_v19  ;;  %2789 = vst [vmem:[#allocation14_spill] sm:$0xff] %v1707_v24 }
  0xa3   :  { %v1703_v22 = vpop.permute.xlu1 %609  ;;  %v1715_v26 = vpop.permute.xlu0 %705 }
  0xa7   :  { %v1713_v25 = vpop.permute.xlu1 %811  ;;  %v1727_v28 = vpop.permute.xlu0 %911 }
  0xa8   :  { %2790 = vst [vmem:[#allocation15_spill] sm:$0xff] %v1713_v25  ;;  %2792 = vst [vmem:[#allocation17_spill] sm:$0xff] %v1727_v28  ;;  %v2913_v25 = vld [vmem:[#allocation7_spill] sm:$0xff] }
  0xab   :  { %v1725_v27 = vpop.permute.xlu1 %806  ;;  %v1736_v33 = vpop.permute.xlu0 %906 }
  0xac   :  { %2791 = vst [vmem:[#allocation16_spill] sm:$0xff] %v1725_v27  ;;  %2793 = vst [vmem:[#allocation18_spill] sm:$0xff] %v1736_v33  ;;  %v2815_v33 = vmov 0 }
  0xaf   :  { %v1734_v32 = vpop.permute.xlu1 %801 }
  0xb3   :  { %v1747_v36 = vpop.permute.xlu1 %1007 }
  0xb4   :  { %2794 = vst [vmem:[#allocation19_spill] sm:$0xff] %v1747_v36 }
  0xc6   :  { %v139_v39 = vpop.f32.mrf.mxu0  ;;  %v222_v40 = vpop.f32.mrf.mxu1 }
  0xc7   :  { %v140_v41 = vadd.f32 %v139_v39, %v38_v38  ;;  %v223_v42 = vadd.f32 %v222_v40, %v38_v38  ;;  %v1751_v39 = vpop.permute.xlu0 %901 }
  0xc8   :  { %v224_v47 = vpop.f32.mrf.mxu1  ;;  %v141_v49 = vpop.f32.mrf.mxu0 }
  0xc9   :  { %v239_v43 = vmax.f32 %v140_v41, 0.0  ;;  %v241_v44 = vmax.f32 %v223_v42, 0.0  ;;  %v225_v48 = vadd.f32 %v224_v47, %v38_v38  ;;  %v142_v50 = vadd.f32 %v141_v49, %v38_v38  ;;  %v1759_v41 = vpop.permute.xlu1 %1002 }
  0xca   :  { %v145_v58 = vpop.f32.mrf.mxu0  ;;  %v228_v59 = vpop.f32.mrf.mxu1  ;;  %2795 = vst [vmem:[#allocation20_spill] sm:$0xff] %v1759_v41  ;;  %v263_v47 = vlaneseq }
  0xcb   :  { %v1587_v45 = vmin.f32 %v239_v43, 6.0  ;;  %v1589_v46 = vmin.f32 %v241_v44, 6.0  ;;  %v242_v51 = vmax.f32 %v225_v48, 0.0  ;;  %v240_v52 = vmax.f32 %v142_v50, 0.0  ;;  %v1761_v42 = vpop.permute.xlu0 %1107 }
  0xcc   :  { %v146_v61 = vadd.f32 %v145_v58, %v43_v57  ;;  %v229_v62 = vadd.f32 %v228_v59, %v43_v57  ;;  %v147_v11 = vpop.f32.mrf.mxu0  ;;  %v230_v16 = vpop.f32.mrf.mxu1  ;;  %2796 = vst [vmem:[#allocation21_spill] sm:$0xff] %v1761_v42  ;;  %v2805_v42 = vmov 0 }
  0xcd   :  { %362 = vrot.lane.b32.xlu1 %v1589_v46, %s1424_s19  ;;  %350 = vrot.lane.b32.xlu0 %v1587_v45, %s1424_s19  ;;  %v1611_v53 = vmin.f32 %v242_v51, 6.0  ;;  %v1617_v54 = vmin.f32 %v240_v52, 6.0  ;;  %v148_v12 = vadd.f32 %v147_v11, %v43_v57  ;;  %v231_v18 = vadd.f32 %v230_v16, %v43_v57  ;;  %v1771_v43 = vpop.permute.xlu1 %997 }
  0xce   :  { %v243_v63 = vmax.f32 %v146_v61, 0.0  ;;  %v245_v0 = vmax.f32 %v229_v62, 0.0  ;;  %v151_v29 = vpop.f32.mrf.mxu0  ;;  %v234_v31 = vpop.f32.mrf.mxu1  ;;  %2797 = vst [vmem:[#allocation22_spill] sm:$0xff] %v1771_v43  ;;  %v1787_v51 = vand.u32 127, %v263_v47  ;;  %v340_v20 = vmul.f32 %v1629_v56, %v1589_v46 }
  0xcf   :  { %v244_v14 = vmax.f32 %v148_v12, 0.0  ;;  %v246_v21 = vmax.f32 %v231_v18, 0.0  ;;  %v152_v30 = vadd.f32 %v151_v29, %v1627_v55  ;;  %v235_v35 = vadd.f32 %v234_v31, %v1627_v55  ;;  %v1773_v44 = vpop.permute.xlu0 %1102 }
  0xd0   :  { %v1653_v5 = vmin.f32 %v243_v63, 6.0  ;;  %v1655_v6 = vmin.f32 %v245_v0, 6.0  ;;  %2798 = vst [vmem:[#allocation23_spill] sm:$0xff] %v1773_v44  ;;  %v153_v50 = vpop.f32.mrf.mxu0  ;;  %v236_v59 = vpop.f32.mrf.mxu1  ;;  %v267_v61 = vadd.s32 384, %v1787_v51  ;;  %v268_v12 = vand.u32 255, %v1787_v51 }
  0xd1   :  { %546 = vrot.lane.b32.xlu1 %v1587_v45, %s1425_s20  ;;  %450 = vrot.lane.b32.xlu0 %v1587_v45, %s1426_s21  ;;  %v1689_v17 = vmin.f32 %v244_v14, 6.0  ;;  %v1705_v23 = vmin.f32 %v246_v21, 6.0  ;;  %v247_v34 = vmax.f32 %v152_v30, 0.0  ;;  %v249_v38 = vmax.f32 %v235_v35, 0.0 }
  0xd2   :  { %v154_v52 = vadd.f32 %v153_v50, %v1627_v55  ;;  %v237_v63 = vadd.f32 %v236_v59, %v1627_v55  ;;  %v265_v14 = vadd.s32 128, %v1787_v51  ;;  %v271_v16 = vand.u32 255, %v267_v61 }
  0xd3   :  { %v1749_v37 = vmin.f32 %v247_v34, 6.0  ;;  %v1757_v40 = vmin.f32 %v249_v38, 6.0  ;;  %v266_v30 = vadd.s32 256, %v1787_v51  ;;  %v1821_v31 = vshra.s32 %v268_v12, 4 }
  0xd4   :  { %v248_v62 = vmax.f32 %v154_v52, 0.0  ;;  %v250_v21 = vmax.f32 %v237_v63, 0.0  ;;  %v1823_v34 = vand.u32 15, %v268_v12  ;;  %v269_v35 = vand.u32 255, %v265_v14 }
  0xd5   :  { %558 = vrot.lane.b32.xlu1 %v1589_v46, %s1425_s20  ;;  %462 = vrot.lane.b32.xlu0 %v1589_v46, %s1426_s21  ;;  %v1825_v38 = vshra.s32 %v271_v16, 4  ;;  %v1827_v47 = vand.u32 15, %v271_v16  ;;  %v270_v61 = vand.u32 255, %v266_v30  ;;  %vm2753_vm2 = vcmp.ge.s32.totalorder %v1821_v31, 1 }
  0xd6   :  { %v1810_v18 = vmin.f32 %v248_v62, 6.0  ;;  %v1829_v50 = vmin.f32 %v250_v21, 6.0  ;;  %vm2736_vm3 = vcmp.ge.s32.totalorder %v1823_v34, 1  ;;  %v1841_v62 = vshra.s32 %v269_v35, 4 }
  0xd7   :  { %v1843_v63 = vand.u32 15, %v269_v35  ;;  %vm2771_vm4 = vcmp.ge.s32.totalorder %v1825_v38, 1  ;;  %vm2734_vm5 = vcmp.ge.s32.totalorder %v1827_v47, 1  ;;  %vm2750_vm6 = vcmp.lt.s32.totalorder %v1787_v51, 17  ;;  %vm1858_vm7 = vmand %vm2753_vm2, %vm2736_vm3 }
  0xd8   :  { %v1850_v16 = vshra.s32 %v270_v61, 4  ;;  %v1852_v21 = vand.u32 15, %v270_v61  ;;  %v2799_v30 = vmov 0  ;;  %vm2751_vm8 = vcmp.lt.s32.totalorder %v1787_v51, 15  ;;  %vm1867_vm9 = vmand %vm2771_vm4, %vm2734_vm5 }
  0xd9   :  { %742 = vrot.lane.b32.xlu1 %v1587_v45, %s1427_s22  ;;  %646 = vrot.lane.b32.xlu0 %v1587_v45, %s1428_s1  ;;  %v2800_v30 = vsel %vm1858_vm7, 4294967295, %v2799_v30  ;;  %v2802_v35 = vmov 0  ;;  %vm2742_vm10 = vcmp.ge.s32.totalorder %v1841_v62, 1  ;;  %vm2739_vm11 = vcmp.lt.s32.totalorder %v1843_v63, 15 }
  0xda   :  { %2801 = vst [vmem:[#allocation24_spill] sm:$0xff] %v2800_v30  ;;  %v2803_v35 = vsel %vm1867_vm9, 4294967295, %v2802_v35  ;;  %vm2738_vm12 = vcmp.ge.s32.totalorder %v1843_v63, 1  ;;  %vm2769_vm13 = vcmp.ge.s32.totalorder %v1850_v16, 1  ;;  %vm2747_vm14 = vcmp.lt.s32.totalorder %v1852_v21, 15  ;;  %vm1897_vm0 = vmand %vm2742_vm10, %vm2739_vm11 }
  0xdb   :  { %2804 = vst [vmem:[#allocation25_spill] sm:$0xff] %v2803_v35  ;;  %vm2746_vm15 = vcmp.ge.s32.totalorder %v1852_v21, 1  ;;  %v2806_v42 = vsel %vm1897_vm0, 4294967295, %v2805_v42  ;;  %vm1919_vm1 = vmand %vm2742_vm10, %vm2738_vm12  ;;  %vm2752_vm5 = vcmp.lt.s32.totalorder %v1823_v34, 15  ;;  %vm2754_vm12 = vcmp.lt.s32.totalorder %v1827_v47, 15 }
  0xdc   :  { %2807 = vst [vmem:[#allocation26_spill] sm:$0xff] %v2806_v42  ;;  %vm1932_vm3 = vmand %vm2769_vm13, %vm2746_vm15  ;;  %vm2772_vm11 = vcmp.lt.s32.totalorder %v1787_v51, 16  ;;  %vm2770_vm15 = vcmp.lt.s32.totalorder %v1787_v51, 127 }
  0xdd   :  { %754 = vrot.lane.b32.xlu1 %v1589_v46, %s1427_s22  ;;  %658 = vrot.lane.b32.xlu0 %v1589_v46, %s1428_s1  ;;  %vm1944_vm10 = vmand %vm2769_vm13, %vm2747_vm14 }
  0xde   :  { %vm1961_vm14 = vmand %vm2753_vm2, %vm2752_vm5  ;;  %vm2773_vm2 = vcmp.lt.s32.totalorder %v1841_v62, 15  ;;  %vm2821_vm5 = vcmp.ge.s32.totalorder %v1841_v62, 1 }
  0xdf   :  { %v2816_v33 = vsel %vm1961_vm14, 4294967295, %v2815_v33 }
  0xe0   :  { %2817 = vst [vmem:[#allocation28_spill] sm:$0xff] %v2816_v33 }
  0xe1   :  { %838 = vrot.lane.b32.xlu1 %v1587_v45, %s1429_s2  ;;  %368 = vrot.lane.b32.xlu0 %v1611_v53, %s1424_s19 }
  0xe5   :  { %850 = vrot.lane.b32.xlu1 %v1589_v46, %s1429_s2  ;;  %552 = vrot.lane.b32.xlu0 %v1617_v54, %s1425_s20 }
  0xe9   :  { %356 = vrot.lane.b32.xlu1 %v1617_v54, %s1424_s19  ;;  %564 = vrot.lane.b32.xlu0 %v1611_v53, %s1425_s20 }
  0xed   :  { %456 = vrot.lane.b32.xlu1 %v1617_v54, %s1426_s21  ;;  %748 = vrot.lane.b32.xlu0 %v1617_v54, %s1427_s22 }
  0xf1   :  { %468 = vrot.lane.b32.xlu1 %v1611_v53, %s1426_s21  ;;  %760 = vrot.lane.b32.xlu0 %v1611_v53, %s1427_s22 }
  0xf5   :  { %652 = vrot.lane.b32.xlu1 %v1617_v54, %s1428_s1  ;;  %844 = vrot.lane.b32.xlu0 %v1617_v54, %s1429_s2 }
  0xf9   :  { %664 = vrot.lane.b32.xlu1 %v1611_v53, %s1428_s1  ;;  %856 = vrot.lane.b32.xlu0 %v1611_v53, %s1429_s2 }
  0xfd   :  { %352 = vrot.lane.b32.xlu1 %v1653_v5, %s1424_s19  ;;  %364 = vrot.lane.b32.xlu0 %v1655_v6, %s1424_s19 }
 0x101   :  { %452 = vrot.lane.b32.xlu1 %v1653_v5, %s1426_s21  ;;  %548 = vrot.lane.b32.xlu0 %v1653_v5, %s1425_s20 }
 0x105   :  { %464 = vrot.lane.b32.xlu1 %v1655_v6, %s1426_s21  ;;  %560 = vrot.lane.b32.xlu0 %v1655_v6, %s1425_s20 }
 0x109   :  { %648 = vrot.lane.b32.xlu1 %v1653_v5, %s1428_s1  ;;  %744 = vrot.lane.b32.xlu0 %v1653_v5, %s1427_s22 }
 0x10d   :  { %660 = vrot.lane.b32.xlu1 %v1655_v6, %s1428_s1  ;;  %756 = vrot.lane.b32.xlu0 %v1655_v6, %s1427_s22 }
 0x111   :  { %840 = vrot.lane.b32.xlu1 %v1653_v5, %s1429_s2  ;;  %358 = vrot.lane.b32.xlu0 %v1689_v17, %s1424_s19 }
 0x115   :  { %852 = vrot.lane.b32.xlu1 %v1655_v6, %s1429_s2  ;;  %458 = vrot.lane.b32.xlu0 %v1689_v17, %s1426_s21 }
 0x119   :  { %940 = vrot.lane.b32.xlu1 %v1653_v5, %s1430_s23  ;;  %470 = vrot.lane.b32.xlu0 %v1705_v23, %s1426_s21 }
 0x11d   :  { %952 = vrot.lane.b32.xlu1 %v1655_v6, %s1430_s23  ;;  %654 = vrot.lane.b32.xlu0 %v1689_v17, %s1428_s1 }
 0x121   :  { %370 = vrot.lane.b32.xlu1 %v1705_v23, %s1424_s19  ;;  %666 = vrot.lane.b32.xlu0 %v1705_v23, %s1428_s1 }
 0x125   :  { %554 = vrot.lane.b32.xlu1 %v1689_v17, %s1425_s20  ;;  %846 = vrot.lane.b32.xlu0 %v1689_v17, %s1429_s2 }
 0x129   :  { %566 = vrot.lane.b32.xlu1 %v1705_v23, %s1425_s20  ;;  %858 = vrot.lane.b32.xlu0 %v1705_v23, %s1429_s2 }
 0x12d   :  { %750 = vrot.lane.b32.xlu1 %v1689_v17, %s1427_s22  ;;  %946 = vrot.lane.b32.xlu0 %v1689_v17, %s1430_s23 }
 0x131   :  { %762 = vrot.lane.b32.xlu1 %v1705_v23, %s1427_s22  ;;  %354 = vrot.lane.b32.xlu0 %v1749_v37, %s1424_s19 }
 0x135   :  { %366 = vrot.lane.b32.xlu1 %v1757_v40, %s1424_s19  ;;  %454 = vrot.lane.b32.xlu0 %v1749_v37, %s1426_s21 }
 0x139   :  { %550 = vrot.lane.b32.xlu1 %v1749_v37, %s1425_s20  ;;  %466 = vrot.lane.b32.xlu0 %v1757_v40, %s1426_s21 }
 0x13d   :  { %562 = vrot.lane.b32.xlu1 %v1757_v40, %s1425_s20  ;;  %650 = vrot.lane.b32.xlu0 %v1749_v37, %s1428_s1 }
 0x13f   :  { %v1779_v48 = vpop.permute.xlu1 %362  ;;  %v1781_v49 = vpop.permute.xlu0 %350 }
 0x141   :  { %746 = vrot.lane.b32.xlu1 %v1749_v37, %s1427_s22  ;;  %662 = vrot.lane.b32.xlu0 %v1757_v40, %s1428_s1 }
 0x143   :  { %v1790_v57 = vpop.permute.xlu1 %546  ;;  %v1792_v58 = vpop.permute.xlu0 %450 }
 0x145   :  { %758 = vrot.lane.b32.xlu1 %v1757_v40, %s1427_s22  ;;  %842 = vrot.lane.b32.xlu0 %v1749_v37, %s1429_s2 }
 0x147   :  { %v1800_v0 = vpop.permute.xlu1 %558  ;;  %v1802_v11 = vpop.permute.xlu0 %462 }
 0x149   :  { %942 = vrot.lane.b32.xlu1 %v1749_v37, %s1430_s23  ;;  %854 = vrot.lane.b32.xlu0 %v1757_v40, %s1429_s2 }
 0x14b   :  { %v1812_v29 = vpop.permute.xlu1 %742  ;;  %v1814_v55 = vpop.permute.xlu0 %646 }
 0x14d   :  { %954 = vrot.lane.b32.xlu1 %v1757_v40, %s1430_s23  ;;  %360 = vrot.lane.b32.xlu0 %v1810_v18, %s1424_s19 }
 0x14f   :  { %v1831_v52 = vpop.permute.xlu1 %754  ;;  %v1833_v59 = vpop.permute.xlu0 %658 }
 0x151   :  { %460 = vrot.lane.b32.xlu1 %v1810_v18, %s1426_s21  ;;  %372 = vrot.lane.b32.xlu0 %v1829_v50, %s1424_s19 }
 0x153   :  { %v1848_v12 = vpop.permute.xlu1 %838  ;;  %v369_v14 = vpop.permute.xlu0 %368 }
 0x154   :  { %v375_v61 = vsel %vm2750_vm6, %v1779_v48, %v369_v14  ;;  %v384_v2 = vsel %vm2750_vm6, %v369_v14, %v1781_v49 }
 0x155   :  { %472 = vrot.lane.b32.xlu1 %v1829_v50, %s1426_s21  ;;  %556 = vrot.lane.b32.xlu0 %v1810_v18, %s1425_s20  ;;  %v399_v14 = vsel %vm1858_vm7, %v384_v2, 0.0  ;;  %v402_v44 = vsel %vm1867_vm9, %v375_v61, 0.0  ;;  %v341_v2 = vmul.f32 %v1629_v56, %v1611_v53  ;;  %v338_v61 = vmul.f32 %v1629_v56, %v1587_v45 }
 0x156   :  { %v426_v7 = vmul.f32 %v1669_v9, %v399_v14  ;;  %v429_v1 = vmul.f32 %v1669_v9, %v402_v44 }
 0x157   :  { %v1884_v3 = vpop.permute.xlu1 %850  ;;  %v553_v43 = vpop.permute.xlu0 %552 }
 0x158   :  { %v574_v36 = vsel %vm2751_vm8, %v553_v43, %v1800_v0  ;;  %v577_v28 = vsel %vm2751_vm8, %v1790_v57, %v553_v43  ;;  %v339_v43 = vmul.f32 %v1629_v56, %v1617_v54  ;;  %v2812_v56 = vmov 0 }
 0x159   :  { %656 = vrot.lane.b32.xlu1 %v1810_v18, %s1428_s1  ;;  %568 = vrot.lane.b32.xlu0 %v1829_v50, %s1425_s20  ;;  %v2813_v56 = vsel %vm1944_vm10, 4294967295, %v2812_v56  ;;  %v596_v60 = vsel %vm1897_vm0, %v577_v28, 0.0 }
 0x15a   :  { %2814 = vst [vmem:[#allocation27_spill] sm:$0xff] %v2813_v56  ;;  %v623_v42 = vmul.f32 %v1703_v22, %v596_v60 }
 0x15b   :  { %v357_v41 = vpop.permute.xlu1 %356  ;;  %v565_v27 = vpop.permute.xlu0 %564 }
 0x15c   :  { %v378_v14 = vsel %vm2750_vm6, %v357_v41, %v1779_v48  ;;  %v381_v44 = vsel %vm2750_vm6, %v1781_v49, %v357_v41  ;;  %v571_v28 = vsel %vm2751_vm8, %v1800_v0, %v565_v27  ;;  %v580_v48 = vsel %vm2751_vm8, %v565_v27, %v1790_v57  ;;  %vm1979_vm6 = vmand %vm2771_vm4, %vm2754_vm12 }
 0x15d   :  { %v400_v19 = vsel %vm1919_vm1, %v381_v44, 0.0  ;;  %v401_v41 = vsel %vm1932_vm3, %v378_v14, 0.0  ;;  %v2818_v49 = vmov 0  ;;  %668 = vrot.lane.b32.xlu1 %v1829_v50, %s1428_s1  ;;  %752 = vrot.lane.b32.xlu0 %v1810_v18, %s1427_s22  ;;  %vm2774_vm8 = vcmp.lt.s32.totalorder %v1787_v51, 1 }
 0x15e   :  { %v2819_v49 = vsel %vm1979_vm6, 4294967295, %v2818_v49  ;;  %v427_v27 = vmul.f32 %v1669_v9, %v400_v19  ;;  %v428_v57 = vmul.f32 %v1669_v9, %v401_v41  ;;  %v438_v0 = vadd.f32 %v426_v7, %v338_v61 }
 0x15f   :  { %2820 = vst [vmem:[#allocation29_spill] sm:$0xff] %v2819_v49  ;;  %v441_v14 = vadd.f32 %v429_v1, %v341_v2  ;;  %v597_v44 = vsel %vm1944_vm10, %v574_v36, 0.0  ;;  %v457_v24 = vpop.permute.xlu1 %456  ;;  %v749_v35 = vpop.permute.xlu0 %748  ;;  %v595_v30 = vsel %vm1961_vm14, %v580_v48, 0.0  ;;  %v598_v19 = vsel %vm1979_vm6, %v571_v28, 0.0 }
 0x160   :  { %v478_v9 = vsel %vm2772_vm11, %v457_v24, %v1802_v11  ;;  %v481_v1 = vsel %vm2772_vm11, %v1792_v58, %v457_v24  ;;  %v770_v36 = vsel %vm2770_vm15, %v749_v35, %v1831_v52  ;;  %v773_v2 = vsel %vm2770_vm15, %v1812_v29, %v749_v35 }
 0x161   :  { %v496_v60 = vsel %vm2821_vm5, %v481_v1, 0.0  ;;  %v497_v7 = vsel %vm2769_vm13, %v478_v9, 0.0  ;;  %848 = vrot.lane.b32.xlu1 %v1810_v18, %s1429_s2  ;;  %764 = vrot.lane.b32.xlu0 %v1829_v50, %s1427_s22  ;;  %v439_v24 = vadd.f32 %v427_v27, %v339_v43  ;;  %v440_v61 = vadd.f32 %v428_v57, %v340_v20 }
 0x162   :  { %v523_v28 = vmul.f32 %v1683_v15, %v496_v60  ;;  %v524_v48 = vmul.f32 %v1683_v15, %v497_v7  ;;  %v624_v41 = vmul.f32 %v1703_v22, %v597_v44  ;;  %v622_v9 = vmul.f32 %v1703_v22, %v595_v30 }
 0x163   :  { %v625_v35 = vmul.f32 %v1703_v22, %v598_v19  ;;  %vm2822_vm5 = vcmp.lt.s32.totalorder %v1843_v63, 15  ;;  %v469_v49 = vpop.permute.xlu1 %468  ;;  %v761_v33 = vpop.permute.xlu0 %760  ;;  %vm2823_vm13 = vcmp.ge.s32.totalorder %v1821_v31, 1  ;;  %v2828_v7 = vmov 0 }
 0x164   :  { %v788_v1 = vsel %vm2822_vm5, %v770_v36, 0.0  ;;  %v535_v56 = vadd.f32 %v523_v28, %v439_v24  ;;  %v536_v10 = vadd.f32 %v524_v48, %v440_v61  ;;  %v475_v20 = vsel %vm2772_vm11, %v1802_v11, %v469_v49 }
 0x165   :  { %v484_v43 = vsel %vm2772_vm11, %v469_v49, %v1792_v58  ;;  %v498_v22 = vsel %vm2771_vm4, %v475_v20, 0.0  ;;  %v767_v27 = vsel %vm2770_vm15, %v1831_v52, %v761_v33  ;;  %v776_v57 = vsel %vm2770_vm15, %v761_v33, %v1812_v29  ;;  %860 = vrot.lane.b32.xlu1 %v1829_v50, %s1429_s2  ;;  %948 = vrot.lane.b32.xlu0 %v1810_v18, %s1430_s23 }
 0x166   :  { %v495_v30 = vsel %vm2823_vm13, %v484_v43, 0.0  ;;  %vm2824_vm5 = vcmp.lt.s32.totalorder %v1823_v34, 15  ;;  %v815_v11 = vmul.f32 %v1734_v32, %v788_v1  ;;  %v525_v44 = vmul.f32 %v1683_v15, %v498_v22 }
 0x167   :  { %v787_v58 = vsel %vm2824_vm5, %v773_v2, 0.0  ;;  %v522_v49 = vmul.f32 %v1683_v15, %v495_v30  ;;  %vm2825_vm13 = vcmp.lt.s32.totalorder %v1852_v21, 15  ;;  %vm2826_vm15 = vcmp.lt.s32.totalorder %v1827_v47, 15  ;;  %v653_v29 = vpop.permute.xlu1 %652  ;;  %v845_v36 = vpop.permute.xlu0 %844 }
 0x168   :  { %v789_v52 = vsel %vm2825_vm13, %v767_v27, 0.0  ;;  %v790_v33 = vsel %vm2826_vm15, %v776_v57, 0.0  ;;  %v635_v19 = vadd.f32 %v623_v42, %v535_v56  ;;  %v636_v60 = vadd.f32 %v624_v41, %v536_v10 }
 0x169   :  { %vm2827_vm4 = vcmp.ge.s32.totalorder %v1843_v63, 1  ;;  %v534_v2 = vadd.f32 %v522_v49, %v438_v0  ;;  %v537_v15 = vadd.f32 %v525_v44, %v441_v14  ;;  %v674_v24 = vsel %vm2774_vm8, %v653_v29, %v1833_v59  ;;  %1038 = vrot.lane.b32.xlu1 %v1749_v37, %s1431_s24  ;;  %960 = vrot.lane.b32.xlu0 %v1829_v50, %s1430_s23 }
 0x16a   :  { %vm2062_vm5 = vmand %vm2773_vm2, %vm2827_vm4  ;;  %v677_v42 = vsel %vm2774_vm8, %v1814_v55, %v653_v29  ;;  %vm2830_vm15 = vcmp.ge.s32.totalorder %v1823_v34, 1  ;;  %vm2831_vm13 = vcmp.lt.s32.totalorder %v1821_v31, 15  ;;  %v2832_v10 = vmov 0 }
 0x16b   :  { %v2829_v7 = vsel %vm2062_vm5, 4294967295, %v2828_v7  ;;  %vm2076_vm11 = vmand %vm2831_vm13, %vm2830_vm15  ;;  %v692_v56 = vsel %vm2827_vm4, %v677_v42, 0.0  ;;  %vm2834_vm2 = vcmp.ge.s32.totalorder %v1852_v21, 1  ;;  %vm2835_vm12 = vcmp.lt.s32.totalorder %v1787_v51, 113  ;;  %v665_v30 = vpop.permute.xlu1 %664  ;;  %v857_v49 = vpop.permute.xlu0 %856 }
 0x16c   :  { %v2833_v10 = vsel %vm2076_vm11, 4294967295, %v2832_v10  ;;  %v693_v0 = vsel %vm2834_vm2, %v674_v24, 0.0  ;;  %v866_v14 = vsel %vm2835_vm12, %v845_v36, %v1884_v3  ;;  %vm2836_vm8 = vmmov %vm2835_vm12  ;;  %v816_v28 = vmul.f32 %v1734_v32, %v789_v52 }
 0x16d   :  { %v869_v61 = vsel %vm2836_vm8, %v1848_v12, %v845_v36  ;;  %v719_v48 = vmul.f32 %v1715_v26, %v692_v56  ;;  %v720_v41 = vmul.f32 %v1715_v26, %v693_v0  ;;  %v888_v1 = vsel %vm2062_vm5, %v866_v14, 0.0  ;;  %1050 = vrot.lane.b32.xlu1 %v1757_v40, %s1431_s24  ;;  %958 = vrot.lane.b32.xlu0 %v1705_v23, %s1430_s23 }
 0x16e   :  { %v887_v20 = vsel %vm2076_vm11, %v869_v61, 0.0  ;;  %v915_v43 = vmul.f32 %v1751_v39, %v888_v1  ;;  %v634_v22 = vadd.f32 %v622_v9, %v534_v2  ;;  %v637_v27 = vadd.f32 %v625_v35, %v537_v15 }
 0x16f   :  { %vm2837_vm8 = vcmp.lt.s32.totalorder %v1850_v16, 15  ;;  %v731_v44 = vadd.f32 %v719_v48, %v635_v19  ;;  %v732_v52 = vadd.f32 %v720_v41, %v636_v60  ;;  %vm2840_vm15 = vcmp.lt.s32.totalorder %v1787_v51, 1  ;;  %v2151_v14 = vpop.permute.xlu0 %364 }
 0x170   :  { %vm2106_vm12 = vmand %vm2837_vm8, %vm2834_vm2  ;;  %v671_v29 = vsel %vm2840_vm15, %v1833_v59, %v665_v30  ;;  %vm2842_vm4 = vcmp.ge.s32.totalorder %v1827_v47, 1  ;;  %vm2843_vm5 = vcmp.lt.s32.totalorder %v1825_v38, 15  ;;  %vm2846_vm2 = vcmp.ge.s32.totalorder %v1823_v34, 1 }
 0x171   :  { %vm2841_vm13 = vmmov %vm2840_vm15  ;;  %vm2848_vm15 = vcmp.lt.s32.totalorder %v1787_v51, 113  ;;  %v827_v36 = vadd.f32 %v815_v11, %v731_v44  ;;  %v828_v24 = vadd.f32 %v816_v28, %v732_v52  ;;  %v814_v42 = vmul.f32 %v1734_v32, %v787_v58  ;;  %v2149_v11 = vpop.permute.xlu1 %352  ;;  %1044 = vrot.lane.b32.xlu0 %v1810_v18, %s1431_s24 }
 0x172   :  { %v680_v9 = vsel %vm2841_vm13, %v665_v30, %v1814_v55  ;;  %vm2120_vm6 = vmand %vm2843_vm5, %vm2842_vm4  ;;  %v863_v59 = vsel %vm2848_vm15, %v1884_v3, %v857_v49  ;;  %v320_v3 = vld [vmem:[%s2721_s3 + $0xc0] sm:$0xff]  ;;  %v914_v58 = vmul.f32 %v1751_v39, %v887_v20  ;;  %v1136_v20 = vld [vmem:[%s2722_s4 + $0x10] sm:$0xff]  ;;  %vm2854_vm5 = vcmp.lt.s32.totalorder %v1787_v51, 17 }
 0x173   :  { %v691_v19 = vsel %vm2846_vm2, %v680_v9, 0.0  ;;  %vm2847_vm8 = vmmov %vm2842_vm4  ;;  %v889_v56 = vsel %vm2106_vm12, %v863_v59, 0.0  ;;  %1097 = vperm.xlu1 %1395, %v320_v3   ;;  %vm2856_vm2 = vcmp.lt.s32.totalorder %v1787_v51, 16 }
 0x174   :  { %v694_v60 = vsel %vm2847_vm8, %v671_v29, 0.0  ;;  %vm2849_vm13 = vmmov %vm2848_vm15  ;;  %v718_v2 = vmul.f32 %v1715_v26, %v691_v19  ;;  %v916_v48 = vmul.f32 %v1751_v39, %v889_v56  ;;  %v1135_v19 = vld [vmem:[%s2722_s4 + $0x8] sm:$0xff]  ;;  %v343_v56 = vmul.f32 %v1647_v4, %v1689_v17 }
 0x175   :  { %v872_v55 = vsel %vm2849_vm13, %v857_v49, %v1848_v12  ;;  %v721_v15 = vmul.f32 %v1715_v26, %v694_v60  ;;  %v817_v12 = vmul.f32 %v1734_v32, %v790_v33  ;;  %v2153_v26 = vadd.f32 %v915_v43, %v827_v36  ;;  %v453_v30 = vpop.permute.xlu1 %452  ;;  %v2162_v49 = vpop.permute.xlu0 %548  ;;  %1056 = vrot.lane.b32.xlu0 %v1829_v50, %s1431_s24  ;;  %vm2855_vm4 = vmmov %vm2854_vm5 }
 0x176   :  { %v890_v0 = vsel %vm2120_vm6, %v872_v55, 0.0  ;;  %v730_v61 = vadd.f32 %v718_v2, %v634_v22  ;;  %v2160_v1 = vadd.f32 %v916_v48, %v828_v24  ;;  %vm2857_vm8 = vmmov %vm2856_vm2  ;;  %vm2858_vm15 = vcmp.ge.s32.totalorder %v1841_v62, 1 }
 0x177   :  { %2850 = vst [vmem:[#allocation30_spill] sm:$0xff] %v2153_v26  ;;  %v733_v28 = vadd.f32 %v721_v15, %v637_v27  ;;  %v917_v41 = vmul.f32 %v1751_v39, %v890_v0  ;;  %938 = vrot.lane.b32.xlu1 %v1587_v45, %s1430_s23  ;;  %v344_v0 = vmul.f32 %v1647_v4, %v1655_v6  ;;  %vm2859_vm13 = vcmp.ge.s32.totalorder %v1850_v16, 1  ;;  %v2914_v26 = vld [vmem:[#allocation8_spill] sm:$0xff] }
 0x178   :  { %v826_v32 = vadd.f32 %v814_v42, %v730_v61  ;;  %2851 = vst [vmem:[#allocation31_spill] sm:$0xff] %v2160_v1 }
 0x179   :  { %v829_v33 = vadd.f32 %v817_v12, %v733_v28  ;;  %v465_v39 = vpop.permute.xlu1 %464  ;;  %v2175_v27 = vpop.permute.xlu0 %560  ;;  %1149 = vperm.xlu0 %1394, %v1136_v20  }
 0x17a   :  { %v2166_v22 = vadd.f32 %v914_v58, %v826_v32  ;;  %v2860_v32 = vld [vmem:[#allocation10_spill] sm:$0xff] }
 0x17b   :  { %v2164_v43 = vadd.f32 %v917_v41, %v829_v33  ;;  %950 = vrot.lane.b32.xlu1 %v1589_v46, %s1430_s23 }
 0x17c   :  { %2853 = vst [vmem:[#allocation33_spill] sm:$0xff] %v2166_v22 }
 0x17d   :  { %2852 = vst [vmem:[#allocation32_spill] sm:$0xff] %v2164_v43  ;;  %v649_v44 = vpop.permute.xlu1 %648  ;;  %v2179_v52 = vpop.permute.xlu0 %744  ;;  %944 = vrot.lane.b32.xlu0 %v1617_v54, %s1430_s23 }
 0x17f   :  { %1036 = vrot.lane.b32.xlu1 %v1653_v5, %s1431_s24 }
 0x181   :  { %v661_v29 = vpop.permute.xlu1 %660  ;;  %v2185_v9 = vpop.permute.xlu0 %756  ;;  %956 = vrot.lane.b32.xlu0 %v1611_v53, %s1430_s23 }
 0x183   :  { %1048 = vrot.lane.b32.xlu1 %v1655_v6, %s1431_s24 }
 0x185   :  { %v2194_v60 = vpop.permute.xlu1 %840  ;;  %v359_v59 = vpop.permute.xlu0 %358  ;;  %1042 = vrot.lane.b32.xlu0 %v1689_v17, %s1431_s24 }
 0x186   :  { %v379_v55 = vsel %vm2854_vm5, %v359_v59, %v2151_v14  ;;  %v382_v36 = vsel %vm2855_vm4, %v2149_v11, %v359_v59  ;;  %vm2861_vm5 = vmmov %vm2856_vm2 }
 0x187   :  { %v404_v2 = vsel %vm1919_vm1, %v382_v36, 0.0  ;;  %v405_v15 = vsel %vm1932_vm3, %v379_v55, 0.0  ;;  %1144 = vperm.xlu1 %1395, %v1135_v19   ;;  %vm2862_vm4 = vmmov %vm2856_vm2 }
 0x188   :  { %v431_v24 = vmul.f32 %v1663_v8, %v404_v2  ;;  %v432_v3 = vmul.f32 %v1663_v8, %v405_v15  ;;  %v1189_v2 = vld [vmem:[%s2724_s6] sm:$0xf] }
 0x189   :  { %v2210_v42 = vpop.permute.xlu1 %852  ;;  %v459_v12 = vpop.permute.xlu0 %458  ;;  %1054 = vrot.lane.b32.xlu0 %v1705_v23, %s1431_s24 }
 0x18a   :  { %v479_v61 = vsel %vm2856_vm2, %v459_v12, %v465_v39  ;;  %v482_v28 = vsel %vm2857_vm8, %v453_v30, %v459_v12  ;;  %v443_v17 = vadd.f32 %v431_v24, %v343_v56  ;;  %v444_v6 = vadd.f32 %v432_v3, %v344_v0 }
 0x18b   :  { %v500_v48 = vsel %vm2858_vm15, %v482_v28, 0.0  ;;  %v501_v58 = vsel %vm2859_vm13, %v479_v61, 0.0  ;;  %1040 = vrot.lane.b32.xlu1 %v1617_v54, %s1431_s24  ;;  %vm2863_vm2 = vcmp.lt.s32.totalorder %v1787_v51, 1  ;;  %vm2865_vm15 = vcmp.ge.s32.totalorder %v1821_v31, 1 }
 0x18c   :  { %v527_v33 = vmul.f32 %v2860_v32, %v500_v48  ;;  %v528_v41 = vmul.f32 %v2860_v32, %v501_v58  ;;  %vm2864_vm8 = vmmov %vm2863_vm2  ;;  %vm2866_vm13 = vcmp.ge.s32.totalorder %v1825_v38, 1  ;;  %v342_v58 = vmul.f32 %v1647_v4, %v1653_v5 }
 0x18d   :  { %v2230_v20 = vpop.permute.xlu1 %940  ;;  %v471_v19 = vpop.permute.xlu0 %470  ;;  %1034 = vrot.lane.b32.xlu0 %v1587_v45, %s1431_s24  ;;  %v1134_v45 = vld [vmem:[%s2722_s4] sm:$0xff] }
 0x18e   :  { %v539_v59 = vadd.f32 %v527_v33, %v443_v17  ;;  %v540_v55 = vadd.f32 %v528_v41, %v444_v6  ;;  %v476_v36 = vsel %vm2861_vm5, %v465_v39, %v471_v19  ;;  %v485_v54 = vsel %vm2862_vm4, %v471_v19, %v453_v30 }
 0x18f   :  { %1052 = vrot.lane.b32.xlu1 %v1611_v53, %s1431_s24  ;;  %v499_v53 = vsel %vm2865_vm15, %v485_v54, 0.0  ;;  %v502_v30 = vsel %vm2866_vm13, %v476_v36, 0.0  ;;  %vm2867_vm5 = vcmp.ge.s32.totalorder %v1843_v63, 1  ;;  %vm2868_vm4 = vcmp.lt.s32.totalorder %v1787_v51, 17  ;;  %vm2870_vm15 = vmmov %vm2864_vm8  ;;  %v2874_v36 = vld [vmem:[#allocation14_spill] sm:$0xff] }
 0x190   :  { %v529_v5 = vmul.f32 %v2860_v32, %v502_v30  ;;  %vm2895_vm13 = vcmp.lt.s32.totalorder %v1843_v63, 15 }
 0x191   :  { %v2243_v15 = vpop.permute.xlu1 %952  ;;  %v655_v24 = vpop.permute.xlu0 %654  ;;  %1046 = vrot.lane.b32.xlu0 %v1589_v46, %s1431_s24 }
 0x192   :  { %v675_v3 = vsel %vm2863_vm2, %v655_v24, %v661_v29  ;;  %v678_v39 = vsel %vm2864_vm8, %v649_v44, %v655_v24  ;;  %vm2869_vm2 = vmmov %vm2868_vm4 }
 0x193   :  { %1192 = vperm.xlu1 %1395, %v1189_v2   ;;  %v696_v12 = vsel %vm2867_vm5, %v678_v39, 0.0  ;;  %vm2873_vm5 = vcmp.ge.s32.totalorder %v1852_v21, 1 }
 0x194   :  { %v697_v19 = vsel %vm2873_vm5, %v675_v3, 0.0  ;;  %v723_v54 = vmul.f32 %v2874_v36, %v696_v12  ;;  %vm2881_vm5 = vcmp.ge.s32.totalorder %v1823_v34, 1 }
 0x195   :  { %v371_v56 = vpop.permute.xlu1 %370  ;;  %v667_v0 = vpop.permute.xlu0 %666  ;;  %1139 = vperm.xlu0 %1394, %v1134_v45  }
 0x196   :  { %v376_v61 = vsel %vm2868_vm4, %v2151_v14, %v371_v56  ;;  %v385_v46 = vsel %vm2869_vm2, %v371_v56, %v2149_v11  ;;  %v672_v28 = vsel %vm2864_vm8, %v661_v29, %v667_v0  ;;  %v681_v48 = vsel %vm2870_vm15, %v667_v0, %v649_v44 }
 0x197   :  { %v403_v6 = vsel %vm1858_vm7, %v385_v46, 0.0  ;;  %v406_v41 = vsel %vm1867_vm9, %v376_v61, 0.0  ;;  %v345_v14 = vmul.f32 %v1647_v4, %v1705_v23  ;;  %v526_v44 = vmul.f32 %v2860_v32, %v499_v53  ;;  %v2882_v61 = vld [vmem:[#allocation12_spill] sm:$0xff] }
 0x198   :  { %v430_v11 = vmul.f32 %v1663_v8, %v403_v6  ;;  %v433_v29 = vmul.f32 %v1663_v8, %v406_v41  ;;  %vm2875_vm4 = vcmp.lt.s32.totalorder %v1787_v51, 15  ;;  %vm2879_vm8 = vcmp.lt.s32.totalorder %v1787_v51, 113 }
 0x199   :  { %v555_v2 = vpop.permute.xlu1 %554  ;;  %v847_v24 = vpop.permute.xlu0 %846  ;;  %vm2876_vm2 = vmmov %vm2875_vm4  ;;  %v724_v56 = vmul.f32 %v2874_v36, %v697_v19  ;;  %v695_v0 = vsel %vm2881_vm5, %v681_v48, 0.0  ;;  %vm2888_vm5 = vcmp.lt.s32.totalorder %v1787_v51, 113 }
 0x19a   :  { %v442_v39 = vadd.f32 %v430_v11, %v342_v58  ;;  %v445_v45 = vadd.f32 %v433_v29, %v345_v14  ;;  %v575_v4 = vsel %vm2875_vm4, %v555_v2, %v2175_v27  ;;  %v578_v8 = vsel %vm2876_vm2, %v2162_v49, %v555_v2  ;;  %vm2880_vm15 = vmmov %vm2879_vm8 }
 0x19b   :  { %v600_v32 = vsel %vm1897_vm0, %v578_v8, 0.0  ;;  %v601_v3 = vsel %vm1944_vm10, %v575_v4, 0.0  ;;  %v867_v30 = vsel %vm2879_vm8, %v847_v24, %v2210_v42  ;;  %v870_v12 = vsel %vm2880_vm15, %v2194_v60, %v847_v24  ;;  %vm2884_vm8 = vmmov %vm2876_vm2 }
 0x19c   :  { %v627_v46 = vmul.f32 %v2882_v61, %v600_v32  ;;  %v628_v58 = vmul.f32 %v2882_v61, %v601_v3  ;;  %vm2883_vm4 = vcmp.ge.s32.totalorder %v1827_v47, 1  ;;  %v891_v41 = vsel %vm2076_vm11, %v870_v12, 0.0  ;;  %v2886_v32 = vld [vmem:[#allocation29_spill] sm:$0xff] }
 0x19d   :  { %v698_v6 = vsel %vm2883_vm4, %v672_v28, 0.0  ;;  %v567_v14 = vpop.permute.xlu1 %566  ;;  %v538_v11 = vadd.f32 %v526_v44, %v442_v39  ;;  %v541_v29 = vadd.f32 %v529_v5, %v445_v45  ;;  %v859_v2 = vpop.permute.xlu0 %858  ;;  %vm2887_vm15 = vnez %v2886_v32  ;;  %vm2889_vm4 = vmmov %vm2888_vm5  ;;  %v2891_v45 = vld [vmem:[#allocation18_spill] sm:$0xff] }
 0x19e   :  { %v639_v24 = vadd.f32 %v627_v46, %v539_v59  ;;  %v640_v4 = vadd.f32 %v628_v58, %v540_v55  ;;  %v572_v48 = vsel %vm2876_vm2, %v2175_v27, %v567_v14  ;;  %v581_v19 = vsel %vm2884_vm8, %v567_v14, %v2162_v49 }
 0x19f   :  { %v599_v28 = vsel %vm1961_vm14, %v581_v19, 0.0  ;;  %v602_v3 = vsel %vm2887_vm15, %v572_v48, 0.0  ;;  %v864_v44 = vsel %vm2888_vm5, %v2210_v42, %v859_v2  ;;  %v873_v59 = vsel %vm2889_vm4, %v859_v2, %v2194_v60 }
 0x1a0   :  { %v722_v27 = vmul.f32 %v2874_v36, %v695_v0  ;;  %v725_v55 = vmul.f32 %v2874_v36, %v698_v6  ;;  %v626_v49 = vmul.f32 %v2882_v61, %v599_v28  ;;  %v629_v5 = vmul.f32 %v2882_v61, %v602_v3  ;;  %v2898_v6 = vld [vmem:[#allocation16_spill] sm:$0xff] }
 0x1a1   :  { %vm2890_vm2 = vnez %v2829_v7  ;;  %v918_v12 = vmul.f32 %v2891_v45, %v891_v41  ;;  %v751_v46 = vpop.permute.xlu1 %750  ;;  %v735_v58 = vadd.f32 %v723_v54, %v639_v24  ;;  %v947_v42 = vpop.permute.xlu0 %946  ;;  %v736_v14 = vadd.f32 %v724_v56, %v640_v4 }
 0x1a2   :  { %v892_v39 = vsel %vm2890_vm2, %v867_v30, 0.0  ;;  %v638_v48 = vadd.f32 %v626_v49, %v538_v11  ;;  %v641_v19 = vadd.f32 %v629_v5, %v541_v29  ;;  %vm2892_vm8 = vcmp.lt.s32.totalorder %v1787_v51, 127 }
 0x1a3   :  { %v771_v60 = vsel %vm2892_vm8, %v751_v46, %v2185_v9  ;;  %vm2893_vm5 = vmmov %vm2892_vm8  ;;  %vm2894_vm4 = vcmp.lt.s32.totalorder %v1823_v34, 15  ;;  %vm2896_vm2 = vcmp.lt.s32.totalorder %v1787_v51, 112  ;;  %vm2899_vm8 = vcmp.lt.s32.totalorder %v1821_v31, 15 }
 0x1a4   :  { %v774_v36 = vsel %vm2893_vm5, %v2179_v52, %v751_v46  ;;  %v792_v30 = vsel %vm2895_vm13, %v771_v60, 0.0  ;;  %v967_v54 = vsel %vm2896_vm2, %v947_v42, %v2243_v15  ;;  %vm2897_vm11 = vmmov %vm2896_vm2  ;;  %v734_v61 = vadd.f32 %v722_v27, %v638_v48  ;;  %v2902_v48 = vld [vmem:[#allocation20_spill] sm:$0xff] }
 0x1a5   :  { %v791_v0 = vsel %vm2894_vm4, %v774_v36, 0.0  ;;  %v970_v56 = vsel %vm2897_vm11, %v2230_v20, %v947_v42  ;;  %v819_v11 = vmul.f32 %v2898_v6, %v792_v30  ;;  %v919_v2 = vmul.f32 %v2891_v45, %v892_v39  ;;  %v763_v28 = vpop.permute.xlu1 %762  ;;  %v355_v49 = vpop.permute.xlu0 %354  ;;  %vm2901_vm11 = vmmov %vm2893_vm5 }
 0x1a6   :  { %v818_v41 = vmul.f32 %v2898_v6, %v791_v0  ;;  %v987_v29 = vsel %vm2899_vm8, %v970_v56, 0.0  ;;  %v893_v24 = vsel %vm2106_vm12, %v864_v44, 0.0  ;;  %vm2900_vm13 = vcmp.lt.s32.totalorder %v1841_v62, 15  ;;  %vm2903_vm2 = vmmov %vm2893_vm5 }
 0x1a7   :  { %v988_v4 = vsel %vm2900_vm13, %v967_v54, 0.0  ;;  %v737_v3 = vadd.f32 %v725_v55, %v641_v19  ;;  %v894_v27 = vsel %vm2120_vm6, %v873_v59, 0.0  ;;  %v831_v46 = vadd.f32 %v819_v11, %v735_v58 }
 0x1a8   :  { %v830_v5 = vadd.f32 %v818_v41, %v734_v61  ;;  %v768_v42 = vsel %vm2901_vm11, %v2185_v9, %v763_v28  ;;  %v1014_v39 = vmul.f32 %v2902_v48, %v987_v29  ;;  %v1015_v60 = vmul.f32 %v2902_v48, %v988_v4 }
 0x1a9   :  { %v777_v44 = vsel %vm2903_vm2, %v763_v28, %v2179_v52  ;;  %vm2904_vm5 = vcmp.lt.s32.totalorder %v1852_v21, 15  ;;  %v931_v36 = vadd.f32 %v919_v2, %v831_v46  ;;  %vm2905_vm4 = vcmp.lt.s32.totalorder %v1827_v47, 15  ;;  %v367_v0 = vpop.permute.xlu1 %366  ;;  %v455_v30 = vpop.permute.xlu0 %454 }
 0x1aa   :  { %v793_v55 = vsel %vm2904_vm5, %v768_v42, 0.0  ;;  %v930_v19 = vadd.f32 %v918_v12, %v830_v5  ;;  %v794_v59 = vsel %vm2905_vm4, %v777_v44, 0.0  ;;  %v920_v54 = vmul.f32 %v2891_v45, %v893_v24 }
 0x1ab   :  { %v820_v58 = vmul.f32 %v2898_v6, %v793_v55  ;;  %v821_v9 = vmul.f32 %v2898_v6, %v794_v59  ;;  %v2378_v61 = vadd.f32 %v1015_v60, %v931_v36  ;;  %v921_v41 = vmul.f32 %v2891_v45, %v894_v27 }
 0x1ac   :  { %v2376_v56 = vadd.f32 %v1014_v39, %v930_v19  ;;  %vm2907_vm8 = vcmp.lt.s32.totalorder %v1787_v51, 17  ;;  %vm2910_vm2 = vcmp.lt.s32.totalorder %v1787_v51, 16 }
 0x1ad   :  { %v832_v52 = vadd.f32 %v820_v58, %v736_v14  ;;  %v833_v12 = vadd.f32 %v821_v9, %v737_v3  ;;  %v551_v29 = vpop.permute.xlu1 %550  ;;  %v467_v2 = vpop.permute.xlu0 %466  ;;  %vm2908_vm13 = vmmov %vm2907_vm8 }
 0x1ae   :  { %vm2909_vm11 = vmmov %vm2907_vm8 }
 0x1af   :  { %v2381_v11 = vadd.f32 %v920_v54, %v832_v52  ;;  %v2383_v4 = vadd.f32 %v921_v41, %v833_v12  ;;  %vm2911_vm5 = vmmov %vm2910_vm2 }
 0x1b0   :  { %vm2912_vm4 = vmmov %vm2907_vm8 }
 0x1b1   :  { %2906 = vst [vmem:[#allocation10_spill] sm:$0xff] %v2383_v4  ;;  %v563_v28 = vpop.permute.xlu1 %562  ;;  %v651_v6 = vpop.permute.xlu0 %650  ;;  %v348_v4 = vmul.f32 %v2913_v25, %v1757_v40 }
 0x1b5   :  { %v2385_v5 = vpop.permute.xlu1 %746  ;;  %v663_v46 = vpop.permute.xlu0 %662 }
 0x1b9   :  { %v2387_v24 = vpop.permute.xlu1 %758  ;;  %v2389_v42 = vpop.permute.xlu0 %842 }
 0x1bd   :  { %v2391_v39 = vpop.permute.xlu1 %942  ;;  %v2393_v14 = vpop.permute.xlu0 %854 }
 0x1c1   :  { %v2395_v45 = vpop.permute.xlu1 %954  ;;  %v361_v3 = vpop.permute.xlu0 %360 }
 0x1c2   :  { %v383_v59 = vsel %vm2907_vm8, %v355_v49, %v361_v3  ;;  %v380_v52 = vsel %vm2909_vm11, %v361_v3, %v367_v0  ;;  %vm2916_vm8 = vcmp.ge.s32.totalorder %v1841_v62, 1  ;;  %vm2918_vm11 = vcmp.ge.s32.totalorder %v1850_v16, 1 }
 0x1c3   :  { %v408_v58 = vsel %vm1919_vm1, %v383_v59, 0.0  ;;  %v347_v59 = vmul.f32 %v2913_v25, %v1810_v18  ;;  %vm2915_vm1 = vmmov %vm2910_vm2 }
 0x1c5   :  { %v461_v27 = vpop.permute.xlu1 %460  ;;  %v373_v60 = vpop.permute.xlu0 %372 }
 0x1c6   :  { %v386_v9 = vsel %vm2908_vm13, %v373_v60, %v355_v49  ;;  %v483_v41 = vsel %vm2910_vm2, %v455_v30, %v461_v27  ;;  %v480_v43 = vsel %vm2911_vm5, %v461_v27, %v467_v2  ;;  %v377_v1 = vsel %vm2912_vm4, %v367_v0, %v373_v60  ;;  %vm2917_vm13 = vmmov %vm2915_vm1 }
 0x1c7   :  { %v435_v49 = vmul.f32 %v2914_v26, %v408_v58  ;;  %v407_v22 = vsel %vm1858_vm7, %v386_v9, 0.0  ;;  %v409_v27 = vsel %vm1932_vm3, %v380_v52, 0.0  ;;  %v504_v0 = vsel %vm2916_vm8, %v483_v41, 0.0  ;;  %v2922_v52 = vld [vmem:[#allocation9_spill] sm:$0xff] }
 0x1c8   :  { %v505_v17 = vsel %vm2918_vm11, %v480_v43, 0.0  ;;  %v346_v58 = vmul.f32 %v2913_v25, %v1749_v37  ;;  %v410_v13 = vsel %vm1867_vm9, %v377_v1, 0.0  ;;  %v434_v40 = vmul.f32 %v2914_v26, %v407_v22 }
 0x1c9   :  { %v473_v44 = vpop.permute.xlu1 %472  ;;  %v557_v55 = vpop.permute.xlu0 %556  ;;  %vm2919_vm3 = vcmp.ge.s32.totalorder %v1821_v31, 1  ;;  %vm2920_vm7 = vcmp.lt.s32.totalorder %v1787_v51, 15  ;;  %v447_v37 = vadd.f32 %v435_v49, %v347_v59  ;;  %v531_v41 = vmul.f32 %v2922_v52, %v504_v0 }
 0x1ca   :  { %v486_v3 = vsel %vm2915_vm1, %v473_v44, %v455_v30  ;;  %v477_v18 = vsel %vm2917_vm13, %v467_v2, %v473_v44  ;;  %v349_v30 = vmul.f32 %v2913_v25, %v1829_v50  ;;  %v579_v2 = vsel %vm2920_vm7, %v551_v29, %v557_v55  ;;  %vm2921_vm2 = vmmov %vm2920_vm7 }
 0x1cb   :  { %v503_v9 = vsel %vm2919_vm3, %v486_v3, 0.0  ;;  %v436_v44 = vmul.f32 %v2914_v26, %v409_v27  ;;  %vm2923_vm5 = vcmp.ge.s32.totalorder %v1825_v38, 1  ;;  %v532_v22 = vmul.f32 %v2922_v52, %v505_v17  ;;  %vm2924_vm9 = vmmov %vm2921_vm2 }
 0x1cc   :  { %v506_v50 = vsel %vm2923_vm5, %v477_v18, 0.0  ;;  %v576_v33 = vsel %vm2924_vm9, %v557_v55, %v563_v28  ;;  %vm2925_vm4 = vmmov %vm2921_vm2  ;;  %vm2926_vm1 = vcmp.lt.s32.totalorder %v1787_v51, 1  ;;  %v437_v59 = vmul.f32 %v2914_v26, %v410_v13 }
 0x1cd   :  { %v657_v19 = vpop.permute.xlu1 %656  ;;  %v569_v36 = vpop.permute.xlu0 %568  ;;  %v530_v49 = vmul.f32 %v2922_v52, %v503_v9  ;;  %v604_v27 = vsel %vm1897_vm0, %v579_v2, 0.0  ;;  %v446_v18 = vadd.f32 %v434_v40, %v346_v58  ;;  %v533_v55 = vmul.f32 %v2922_v52, %v506_v50  ;;  %vm2927_vm8 = vmmov %vm2926_vm1  ;;  %v2931_v40 = vld [vmem:[#allocation11_spill] sm:$0xff] }
 0x1ce   :  { %v582_v43 = vsel %vm2921_vm2, %v569_v36, %v551_v29  ;;  %v573_v25 = vsel %vm2925_vm4, %v563_v28, %v569_v36  ;;  %v676_v28 = vsel %vm2927_vm8, %v657_v19, %v663_v46  ;;  %vm2928_vm13 = vmmov %vm2926_vm1  ;;  %v605_v26 = vsel %vm1944_vm10, %v576_v33, 0.0 }
 0x1cf   :  { %v603_v0 = vsel %vm1961_vm14, %v582_v43, 0.0  ;;  %v679_v36 = vsel %vm2928_vm13, %v651_v6, %v657_v19  ;;  %v606_v17 = vsel %vm2887_vm15, %v573_v25, 0.0  ;;  %vm2929_vm0 = vmmov %vm2926_vm1  ;;  %vm2930_vm14 = vcmp.ge.s32.totalorder %v1823_v34, 1 }
 0x1d0   :  { %v448_v58 = vadd.f32 %v436_v44, %v348_v4  ;;  %v543_v13 = vadd.f32 %v531_v41, %v447_v37  ;;  %v631_v9 = vmul.f32 %v2931_v40, %v604_v27  ;;  %v630_v2 = vmul.f32 %v2931_v40, %v603_v0  ;;  %v2935_v44 = vld [vmem:[#allocation13_spill] sm:$0xff] }
 0x1d1   :  { %v2403_v54 = vpop.permute.xlu0 %752  ;;  %v669_v12 = vpop.permute.xlu1 %668  ;;  %v542_v19 = vadd.f32 %v530_v49, %v446_v18  ;;  %vm2932_vm10 = vcmp.ge.s32.totalorder %v1843_v63, 1  ;;  %vm2933_vm15 = vcmp.ge.s32.totalorder %v1852_v21, 1  ;;  %vm2934_vm11 = vcmp.ge.s32.totalorder %v1827_v47, 1 }
 0x1d2   :  { %v682_v29 = vsel %vm2926_vm1, %v669_v12, %v651_v6  ;;  %v673_v23 = vsel %vm2929_vm0, %v663_v46, %v669_v12  ;;  %v449_v6 = vadd.f32 %v437_v59, %v349_v30  ;;  %v700_v53 = vsel %vm2932_vm10, %v679_v36, 0.0 }
 0x1d3   :  { %v699_v8 = vsel %vm2930_vm14, %v682_v29, 0.0  ;;  %v701_v32 = vsel %vm2933_vm15, %v676_v28, 0.0  ;;  %v632_v46 = vmul.f32 %v2931_v40, %v605_v26  ;;  %v633_v12 = vmul.f32 %v2931_v40, %v606_v17 }
 0x1d4   :  { %v702_v4 = vsel %vm2934_vm11, %v673_v23, 0.0  ;;  %v726_v37 = vmul.f32 %v2935_v44, %v699_v8  ;;  %v544_v41 = vadd.f32 %v532_v22, %v448_v58  ;;  %v545_v50 = vadd.f32 %v533_v55, %v449_v6 }
 0x1d5   :  { %v765_v60 = vpop.permute.xlu0 %764  ;;  %v849_v1 = vpop.permute.xlu1 %848  ;;  %vm2936_vm3 = vcmp.lt.s32.totalorder %v1787_v51, 127  ;;  %v643_v33 = vadd.f32 %v631_v9, %v543_v13  ;;  %v727_v25 = vmul.f32 %v2935_v44, %v700_v53  ;;  %v728_v29 = vmul.f32 %v2935_v44, %v701_v32  ;;  %v2948_v9 = vld [vmem:[#allocation15_spill] sm:$0xff] }
 0x1d6   :  { %v775_v30 = vsel %vm2936_vm3, %v2385_v5, %v2403_v54  ;;  %v642_v59 = vadd.f32 %v630_v2, %v542_v19  ;;  %v729_v27 = vmul.f32 %v2935_v44, %v702_v4  ;;  %vm2937_vm7 = vmmov %vm2936_vm3  ;;  %v644_v55 = vadd.f32 %v632_v46, %v544_v41 }
 0x1d7   :  { %v772_v22 = vsel %vm2937_vm7, %v2403_v54, %v2387_v24  ;;  %vm2938_vm2 = vmmov %vm2936_vm3  ;;  %v645_v28 = vadd.f32 %v633_v12, %v545_v50  ;;  %vm2940_vm9 = vcmp.lt.s32.totalorder %v1823_v34, 15  ;;  %vm2941_vm4 = vcmp.lt.s32.totalorder %v1787_v51, 113 }
 0x1d8   :  { %v769_v0 = vsel %vm2938_vm2, %v2387_v24, %v765_v60  ;;  %vm2939_vm5 = vmmov %vm2938_vm2  ;;  %v738_v36 = vadd.f32 %v726_v37, %v642_v59  ;;  %v795_v26 = vsel %vm2940_vm9, %v775_v30, 0.0  ;;  %v868_v17 = vsel %vm2941_vm4, %v849_v1, %v2393_v14  ;;  %v2963_v37 = vld [vmem:[#allocation17_spill] sm:$0xff] }
 0x1d9   :  { %v2454_v3 = vpop.permute.xlu0 %948  ;;  %v861_v52 = vpop.permute.xlu1 %860  ;;  %v778_v18 = vsel %vm2939_vm5, %v765_v60, %v2385_v5  ;;  %vm2942_vm1 = vmmov %vm2941_vm4  ;;  %vm2945_vm0 = vcmp.lt.s32.totalorder %v1843_v63, 15  ;;  %vm2946_vm14 = vcmp.lt.s32.totalorder %v1852_v21, 15  ;;  %vm2947_vm10 = vcmp.lt.s32.totalorder %v1827_v47, 15 }
 0x1da   :  { %v871_v54 = vsel %vm2942_vm1, %v2389_v42, %v849_v1  ;;  %vm2943_vm8 = vmmov %vm2942_vm1  ;;  %v796_v23 = vsel %vm2945_vm0, %v772_v22, 0.0  ;;  %v797_v8 = vsel %vm2946_vm14, %v769_v0, 0.0  ;;  %v798_v58 = vsel %vm2947_vm10, %v778_v18, 0.0 }
 0x1db   :  { %v865_v24 = vsel %vm2943_vm8, %v2393_v14, %v861_v52  ;;  %vm2944_vm13 = vmmov %vm2942_vm1  ;;  %vm1058_vm15 = vcmp.lt.s32.totalorder %v1787_v51, 111  ;;  %v739_v13 = vadd.f32 %v727_v25, %v643_v33  ;;  %v740_v40 = vadd.f32 %v728_v29, %v644_v55 }
 0x1dc   :  { %v874_v5 = vsel %vm2944_vm13, %v861_v52, %v2389_v42  ;;  %v741_v14 = vadd.f32 %v729_v27, %v645_v28  ;;  %v822_v2 = vmul.f32 %v2948_v9, %v795_v26  ;;  %vm2949_vm11 = vnez %v2833_v10  ;;  %vm2951_vm7 = vmmov %vm2940_vm9 }
 0x1dd   :  { %v961_v43 = vpop.permute.xlu0 %960  ;;  %v1039_v60 = vpop.permute.xlu1 %1038  ;;  %v895_v42 = vsel %vm2949_vm11, %v871_v54, 0.0  ;;  %vm2950_vm3 = vnez %v2829_v7  ;;  %v897_v19 = vsel %vm2106_vm12, %v865_v24, 0.0  ;;  %v898_v53 = vsel %vm2120_vm6, %v874_v5, 0.0  ;;  %vm2959_vm1 = vmmov %vm2945_vm0  ;;  %v2975_v54 = vld [vmem:[#allocation19_spill] sm:$0xff] }
 0x1de   :  { %v896_v6 = vsel %vm2950_vm3, %v868_v17, 0.0  ;;  %v823_v32 = vmul.f32 %v2948_v9, %v796_v23  ;;  %v834_v52 = vadd.f32 %v822_v2, %v738_v36  ;;  %v824_v46 = vmul.f32 %v2948_v9, %v797_v8  ;;  %vm2964_vm0 = vmmov %vm2946_vm14  ;;  %v2993_v7 = vld [vmem:[#allocation31_spill] sm:$0xff] }
 0x1df   :  { %v825_v12 = vmul.f32 %v2948_v9, %v798_v58  ;;  %vm2952_vm2 = vcmp.lt.s32.totalorder %v1821_v31, 15  ;;  %vm2955_vm12 = vcmp.lt.s32.totalorder %v1787_v51, 112  ;;  %vm2960_vm8 = vcmp.lt.s32.totalorder %v1841_v62, 15 }
 0x1e0   :  { %vm2542_vm5 = vmand %vm2952_vm2, %vm2951_vm7  ;;  %v968_v10 = vsel %vm2955_vm12, %v2454_v3, %v2395_v45  ;;  %v922_v41 = vmul.f32 %v2963_v37, %v895_v42  ;;  %v924_v50 = vmul.f32 %v2963_v37, %v897_v19  ;;  %vm2965_vm14 = vcmp.lt.s32.totalorder %v1850_v16, 15 }
 0x1e1   :  { %v2492_v49 = vpop.permute.xlu0 %958  ;;  %vm2956_vm6 = vmmov %vm2955_vm12  ;;  %v1051_v30 = vpop.permute.xlu1 %1050  ;;  %vm2968_vm11 = vcmp.lt.s32.totalorder %v1827_v47, 15  ;;  %vm2969_vm3 = vcmp.lt.s32.totalorder %v1825_v38, 15  ;;  %v835_v22 = vadd.f32 %v823_v32, %v739_v13  ;;  %v836_v0 = vadd.f32 %v824_v46, %v740_v40  ;;  %v2976_v40 = vld [vmem:[#allocation21_spill] sm:$0xff] }
 0x1e2   :  { %v971_v57 = vsel %vm2956_vm6, %v2391_v39, %v2454_v3  ;;  %vm2957_vm9 = vmmov %vm2956_vm6  ;;  %v923_v3 = vmul.f32 %v2963_v37, %v896_v6  ;;  %v837_v18 = vadd.f32 %v825_v12, %v741_v14  ;;  %v934_v8 = vadd.f32 %v922_v41, %v834_v52 }
 0x1e3   :  { %v965_v34 = vsel %vm2957_vm9, %v2395_v45, %v961_v43  ;;  %vm2958_vm4 = vmmov %vm2956_vm6  ;;  %v925_v45 = vmul.f32 %v2963_v37, %v898_v53  ;;  %v991_v29 = vsel %vm2952_vm2, %v971_v57, 0.0 }
 0x1e4   :  { %v974_v35 = vsel %vm2958_vm4, %v961_v43, %v2391_v39  ;;  %vm2564_vm13 = vmand %vm2960_vm8, %vm2959_vm1  ;;  %v1018_v24 = vmul.f32 %v2975_v54, %v991_v29  ;;  %v935_v58 = vadd.f32 %v923_v3, %v835_v22 }
 0x1e5   :  { %v1045_v1 = vpop.permute.xlu0 %1044  ;;  %vm2576_vm10 = vmand %vm2965_vm14, %vm2964_vm0  ;;  %v937_v13 = vadd.f32 %v925_v45, %v837_v18 }
 0x1e6   :  { %v1064_v39 = vsel %vm1058_vm15, %v1045_v1, %v1051_v30  ;;  %v1067_v43 = vsel %vm1058_vm15, %v1039_v60, %v1045_v1  ;;  %vm2588_vm7 = vmand %vm2969_vm3, %vm2968_vm11  ;;  %v936_v1 = vadd.f32 %v924_v50, %v836_v0  ;;  %v1030_v19 = vadd.f32 %v1018_v24, %v934_v8 }
 0x1e7   :  { %vm2972_vm12 = vmmov %vm2960_vm8  ;;  %v1091_v55 = vsel %vm2542_vm5, %v1067_v43, 0.0  ;;  %v1092_v28 = vsel %vm2564_vm13, %v1064_v39, 0.0 }
 0x1e8   :  { %v992_v59 = vsel %vm2972_vm12, %v968_v10, 0.0  ;;  %vm2973_vm6 = vmmov %vm2965_vm14  ;;  %v1118_v14 = vmul.f32 %v2976_v40, %v1091_v55  ;;  %v1119_v9 = vmul.f32 %v2976_v40, %v1092_v28  ;;  %vm2985_vm12 = vcmp.lt.s32.totalorder %v1821_v31, 15 }
 0x1e9   :  { %v1057_v44 = vpop.permute.xlu0 %1056  ;;  %v993_v47 = vsel %vm2973_vm6, %v965_v34, 0.0  ;;  %vm2974_vm9 = vmmov %vm2969_vm3  ;;  %v1019_v5 = vmul.f32 %v2975_v54, %v992_v59 }
 0x1ea   :  { %v1061_v21 = vsel %vm1058_vm15, %v1051_v30, %v1057_v44  ;;  %v1070_v25 = vsel %vm1058_vm15, %v1057_v44, %v1039_v60  ;;  %v994_v27 = vsel %vm2974_vm9, %v974_v35, 0.0  ;;  %v1020_v60 = vmul.f32 %v2975_v54, %v993_v47  ;;  %vm2977_vm1 = vmmov %vm2958_vm4 }
 0x1eb   :  { %v1093_v36 = vsel %vm2576_vm10, %v1061_v21, 0.0  ;;  %v1094_v26 = vsel %vm2588_vm7, %v1070_v25, 0.0  ;;  %v1021_v23 = vmul.f32 %v2975_v54, %v994_v27  ;;  %v1031_v53 = vadd.f32 %v1019_v5, %v935_v58  ;;  %vm2978_vm8 = vmmov %vm2973_vm6 }
 0x1ec   :  { %v1120_v2 = vmul.f32 %v2976_v40, %v1093_v36  ;;  %v1121_v42 = vmul.f32 %v2976_v40, %v1094_v26  ;;  %v1032_v32 = vadd.f32 %v1020_v60, %v936_v1  ;;  %v1130_v12 = vadd.f32 %v1118_v14, %v1030_v19  ;;  %vm2979_vm0 = vmmov %vm2969_vm3  ;;  %v2984_v1 = vld [vmem:[#allocation23_spill] sm:$0xff] }
 0x1ed   :  { %v1033_v46 = vadd.f32 %v1021_v23, %v937_v13  ;;  %v1131_v10 = vadd.f32 %v1119_v9, %v1031_v53  ;;  %v964_v27 = vsel %vm2958_vm4, %v2243_v15, %v2492_v49  ;;  %v973_v22 = vsel %vm2977_vm1, %v2492_v49, %v2230_v20  ;;  %vm2980_vm14 = vmmov %vm2977_vm1 }
 0x1ee   :  { %v2612_v17 = vpop.permute.xlu1 %1097  ;;  %v1132_v57 = vadd.f32 %v1120_v2, %v1032_v32  ;;  %v989_v55 = vsel %vm2978_vm8, %v964_v27, 0.0  ;;  %v990_v28 = vsel %vm2979_vm0, %v973_v22, 0.0  ;;  %vm2981_vm11 = vmmov %vm2977_vm1  ;;  %vm2986_vm6 = vcmp.lt.s32.totalorder %v1841_v62, 15  ;;  %v2991_v22 = vld [vmem:[#allocation33_spill] sm:$0xff] }
 0x1ef   :  { %v1133_v52 = vadd.f32 %v1121_v42, %v1033_v46  ;;  %vm2982_vm3 = vmmov %vm2977_vm1  ;;  %v1016_v60 = vmul.f32 %v2902_v48, %v989_v55  ;;  %v1017_v23 = vmul.f32 %v2902_v48, %v990_v28  ;;  %v2989_v46 = vld [vmem:[#allocation10_spill] sm:$0xff] }
 0x1f0   :  { %vm2983_vm2 = vmmov %vm2977_vm1 }
 0x1f1   :  { %vm2987_vm9 = vmmov %vm2978_vm8  ;;  %v1028_v62 = vadd.f32 %v1016_v60, %v2381_v11  ;;  %v1029_v16 = vadd.f32 %v1017_v23, %v2989_v46  ;;  %v1188_v46 = vld [vmem:[%s2723_s5] sm:$0xf]  ;;  %s1432_s5 = smov [#allocation2]  }
 0x1f2   :  { %v939_v6 = vpop.permute.xlu1 %938  ;;  %vm2988_vm4 = vmmov %vm2979_vm0  ;;  %s1363_s13 = sshll.u32 %s1432_s5, 4  ;;  %s1364_s13 = int_to_ptr.vmem [resolvable:$true] %s1363_s13 }
 0x1f3   :  { %s1400_s16 = scalar_lea.vmem %s1364_s13, 256  ;;  %p1405_p1 = scmp.lt.s32.totalorder %s1364_s13, %s1364_s13 }
 0x1f4   :  { %v1150_v35 = vpop.permute.xlu0 %1149  ;;  %p1401_p0 = scmp.ne.s32.totalorder %s1364_s13, %s1400_s16  ;;  %p1406_p2 = scmp.lt.s32.totalorder %s1400_s16, %s1400_s16 }
 0x1f5   :  { %v1160_v44 = vadd.f32 %v1150_v35, %v1130_v12  ;;  %v1162_v37 = vadd.f32 %v1150_v35, %v1132_v57  ;;  %v1161_v41 = vadd.f32 %v1150_v35, %v1131_v10  ;;  %v1163_v3 = vadd.f32 %v1150_v35, %v1133_v52  ;;  %v2990_v52 = vld [vmem:[#allocation22_spill] sm:$0xff] }
 0x1f6   :  { %v951_v34 = vpop.permute.xlu1 %950  ;;  %p1407_p3 = por %p1406_p2, %p1405_p1 }
 0x1f7   :  { %v1172_v50 = vmax.f32 %v1160_v44, 0.0  ;;  %v1174_v45 = vmax.f32 %v1162_v37, 0.0  ;;  %v1173_v30 = vmax.f32 %v1161_v41, 0.0  ;;  %v1175_v39 = vmax.f32 %v1163_v3, 0.0 }
 0x1f8   :  { %v945_v21 = vpop.permute.xlu0 %944  ;;  %p1408_p4 = pnand %p1407_p3, %p1401_p0 }
 0x1f9   :  { %v1184_v25 = vmin.f32 %v1172_v50, 6.0  ;;  %v1186_v29 = vmin.f32 %v1174_v45, 6.0  ;;  %v1185_v59 = vmin.f32 %v1173_v30, 6.0  ;;  %v1187_v47 = vmin.f32 %v1175_v39, 6.0 }
 0x1fa   :  { %v1037_v43 = vpop.permute.xlu1 %1036  ;;  %v966_v15 = vsel %vm2980_vm14, %v945_v21, %v951_v34  ;;  %v969_v36 = vsel %vm2981_vm11, %v939_v6, %v945_v21 }
 0x1fb   :  { %1225 = vmatprep.subr.mxu0 %v1185_v59  ;;  %1296 = vmatprep.subr.mxu1 %v1187_v47  ;;  %v983_v14 = vsel %vm2985_vm12, %v969_v36, 0.0  ;;  %v984_v9 = vsel %vm2986_vm6, %v966_v15, 0.0 }
 0x1fc   :  { %v957_v18 = vpop.permute.xlu0 %956  ;;  %1226 = vmatpush1.msra.mxu0 %v1184_v25  ;;  %1297 = vmatpush1.msra.mxu1 %v1186_v29  ;;  %v1011_v35 = vmul.f32 %v2990_v52, %v984_v9 }
 0x1fd   :  { %v963_v49 = vsel %vm2982_vm3, %v951_v34, %v957_v18  ;;  %v972_v54 = vsel %vm2983_vm2, %v957_v18, %v939_v6  ;;  %v1010_v34 = vmul.f32 %v2990_v52, %v983_v14  ;;  %v2992_v18 = vld [vmem:[#allocation30_spill] sm:$0xff] }
 0x1fe   :  { %v1049_v0 = vpop.permute.xlu1 %1048  ;;  %v985_v2 = vsel %vm2987_vm9, %v963_v49, 0.0  ;;  %v986_v48 = vsel %vm2988_vm4, %v972_v54, 0.0  ;;  %v1023_v55 = vadd.f32 %v1011_v35, %v2992_v18  ;;  %v2994_v49 = vld [vmem:[#allocation32_spill] sm:$0xff] }
 0x1ff   :  { %v1012_v11 = vmul.f32 %v2990_v52, %v985_v2  ;;  %v1013_v44 = vmul.f32 %v2990_v52, %v986_v48 }
 0x200   :  { %v1043_v20 = vpop.permute.xlu0 %1042 }
 0x201   :  { %v1063_v24 = vsel %vm1058_vm15, %v1043_v20, %v1049_v0  ;;  %v1066_v5 = vsel %vm1058_vm15, %v1037_v43, %v1043_v20  ;;  %v1024_v20 = vadd.f32 %v1012_v11, %v2993_v7  ;;  %v1025_v33 = vadd.f32 %v1013_v44, %v2994_v49  ;;  %v1398_v11 = vld [vmem:[%s2718_s0 + $0x8] sm:$0xff] }
 0x202   :  { %v1145_v26 = vpop.permute.xlu1 %1144  ;;  %v1087_v8 = vsel %vm2542_vm5, %v1066_v5, 0.0  ;;  %v1088_v58 = vsel %vm2564_vm13, %v1063_v24, 0.0 }
 0x203   :  { %v1114_v13 = vmul.f32 %v2984_v1, %v1087_v8  ;;  %v1115_v40 = vmul.f32 %v2984_v1, %v1088_v58 }
 0x204   :  { %v1055_v6 = vpop.permute.xlu0 %1054 }
 0x205   :  { %v1126_v19 = vadd.f32 %v1114_v13, %v2376_v56  ;;  %v1127_v53 = vadd.f32 %v1115_v40, %v2378_v61  ;;  %v1060_v32 = vsel %vm1058_vm15, %v1049_v0, %v1055_v6  ;;  %v1069_v31 = vsel %vm1058_vm15, %v1055_v6, %v1037_v43 }
 0x206   :  { %v1041_v42 = vpop.permute.xlu1 %1040  ;;  %v1089_v38 = vsel %vm2576_vm10, %v1060_v32, 0.0  ;;  %v1090_v12 = vsel %vm2588_vm7, %v1069_v31, 0.0  ;;  %v1022_v0 = vadd.f32 %v1010_v34, %v2991_v22 }
 0x207   :  { %v1156_v10 = vadd.f32 %v1145_v26, %v1126_v19  ;;  %v1116_v56 = vmul.f32 %v2984_v1, %v1089_v38  ;;  %v1117_v61 = vmul.f32 %v2984_v1, %v1090_v12  ;;  %v1157_v57 = vadd.f32 %v1145_v26, %v1127_v53 }
 0x208   :  { %v1035_v41 = vpop.permute.xlu0 %1034 }
 0x209   :  { %v1128_v3 = vadd.f32 %v1116_v56, %v1028_v62  ;;  %v1129_v50 = vadd.f32 %v1117_v61, %v1029_v16  ;;  %v1065_v45 = vsel %vm1058_vm15, %v1035_v41, %v1041_v42  ;;  %v1169_v21 = vmax.f32 %v1157_v57, 0.0 }
 0x20a   :  { %v1053_v37 = vpop.permute.xlu1 %1052  ;;  %v1083_v39 = vsel %vm2542_vm5, %v1065_v45, 0.0  ;;  %v1168_v25 = vmax.f32 %v1156_v10, 0.0  ;;  %v2996_v45 = vld [vmem:[#allocation5_spill] sm:$0xff] }
 0x20b   :  { %v1068_v30 = vsel %vm1058_vm15, %v1053_v37, %v1035_v41  ;;  %v1158_v29 = vadd.f32 %v1145_v26, %v1128_v3  ;;  %v1110_v59 = vmul.f32 %v2612_v17, %v1083_v39  ;;  %v1159_v27 = vadd.f32 %v1145_v26, %v1129_v50  ;;  %v1399_v3 = vld [vmem:[%s2718_s0] sm:$0xff] }
 0x20c   :  { %v1086_v43 = vsel %vm2588_vm7, %v1068_v30, 0.0  ;;  %v1047_v28 = vpop.permute.xlu0 %1046  ;;  %v1181_v15 = vmin.f32 %v1169_v21, 6.0  ;;  %v1180_v36 = vmin.f32 %v1168_v25, 6.0 }
 0x20d   :  { %v1113_v47 = vmul.f32 %v2612_v17, %v1086_v43  ;;  %v1059_v54 = vsel %vm1058_vm15, %v1047_v28, %v1053_v37  ;;  %v1062_v24 = vsel %vm1058_vm15, %v1041_v42, %v1047_v28  ;;  %v1171_v60 = vmax.f32 %v1159_v27, 0.0  ;;  %v2995_v37 = vld [vmem:[#allocation6_spill] sm:$0xff] }
 0x20e   :  { %v1084_v26 = vsel %vm2564_vm13, %v1062_v24, 0.0  ;;  %v1085_v5 = vsel %vm2576_vm10, %v1059_v54, 0.0  ;;  %1227 = vmatprep.subr.mxu0 %v1181_v15  ;;  %v1170_v23 = vmax.f32 %v1158_v29, 0.0  ;;  %v1122_v13 = vadd.f32 %v1110_v59, %v1022_v0  ;;  %v1193_v38 = vpop.permute.xlu1 %1192 }
 0x20f   :  { %v1111_v8 = vmul.f32 %v2612_v17, %v1084_v26  ;;  %v1112_v58 = vmul.f32 %v2612_v17, %v1085_v5  ;;  %1228 = vmatpush1.msra.mxu0 %v1180_v36  ;;  %v1125_v1 = vadd.f32 %v1113_v47, %v1025_v33  ;;  %v1183_v14 = vmin.f32 %v1171_v60, 6.0 }
 0x210   :  { %v1140_v40 = vpop.permute.xlu0 %1139  ;;  %v1182_v51 = vmin.f32 %v1170_v23, 6.0  ;;  %vm1195_vm15 = vcmask 195584  }
 0x211   :  { %v1123_v9 = vadd.f32 %v1111_v8, %v1023_v55  ;;  %v1124_v2 = vadd.f32 %v1112_v58, %v1024_v20  ;;  %v1152_v4 = vadd.f32 %v1140_v40, %v1122_v13  ;;  %v1155_v48 = vadd.f32 %v1140_v40, %v1125_v1  ;;  %1298 = vmatprep.subr.mxu1 %v1183_v14 }
 0x212   :  { %1299 = vmatpush1.msra.mxu1 %v1182_v51 }
 0x213   :  { %v1153_v63 = vadd.f32 %v1140_v40, %v1123_v9  ;;  %v1154_v42 = vadd.f32 %v1140_v40, %v1124_v2  ;;  %v1167_v6 = vmax.f32 %v1155_v48, 0.0  ;;  %v1164_v19 = vmax.f32 %v1152_v4, 0.0 }
 0x215   :  { %v1165_v53 = vmax.f32 %v1153_v63, 0.0  ;;  %v1166_v32 = vmax.f32 %v1154_v42, 0.0  ;;  %v1179_v31 = vmin.f32 %v1167_v6, 6.0  ;;  %v1176_v16 = vmin.f32 %v1164_v19, 6.0 }
 0x217   :  { %v1178_v17 = vmin.f32 %v1166_v32, 6.0  ;;  %1300 = vmatprep.subr.mxu1 %v1179_v31  ;;  %v1177_v62 = vmin.f32 %v1165_v53, 6.0 }
 0x219   :  { %1229 = vmatprep.subr.mxu0 %v1177_v62  ;;  %1301 = vmatpush1.msra.mxu1 %v1178_v17 }
 0x21a   :  { %1230 = vmatpush1.msra.mxu0 %v1176_v16  ;;  %1382 = vmatmul.mubr.msk.f32.vlgmr.msra.gmra.mxu1 %vm1195_vm15, %v1188_v46 }
 0x21b   :  { %1381 = vmatmul.mubr.msk.f32.vlgmr.msra.gmra.mxu0 %vm1195_vm15, %v1188_v46 }
 0x2da   :  { %v1336_v12 = vpop.f32.mrf.mxu1 }
 0x2db   :  { %v1337_v10 = vadd.f32 %v1336_v12, %v1193_v38  ;;  %v1265_v56 = vpop.f32.mrf.mxu0 }
 0x2dc   :  { %v1266_v61 = vadd.f32 %v1265_v56, %v1193_v38  ;;  %v1338_v57 = vpop.f32.mrf.mxu1 }
 0x2dd   :  { %v1339_v52 = vadd.f32 %v1338_v57, %v1193_v38  ;;  %v1267_v34 = vpop.f32.mrf.mxu0  ;;  %v1345_v44 = vadd.f32 %v1398_v11, %v1337_v10 }
 0x2de   :  { %v1268_v35 = vadd.f32 %v1267_v34, %v1193_v38  ;;  %v1343_v50 = vadd.f32 %v1399_v3, %v1266_v61 }
 0x2df   :  { %v1346_v41 = vadd.f32 %v1339_v52, %v2995_v37 }
 0x2e0   :  { %v1344_v30 = vadd.f32 %v1268_v35, %v2996_v45 }
 0x2e1   :  { %v1352_v39 = vcombine.low %v1345_v44, %v1346_v41 }
 0x2e2   :  { %v1351_v43 = vcombine.low %v1343_v50, %v1344_v30 }
 0x2e3   :  { %1356 = vst [vmem:[#allocation2 + $0x8] sm:$0xff] %v1352_v39 }
 0x2e4   :  { %1355 = vst [vmem:[#allocation2] sm:$0xff] %v1351_v43 }
 0x2e5   :  { %1411 = shalt.err (!%p1408_p4)
}
 0x2e6   :  { %1366 = dma.vmem_to_hbm [thread:$0]  %s1364_s13, 256, %s2725_s7, [#allocation3]  }
 0x2e7   :  { %1420 = dma.done.wait [#allocation3], 256  }
 0x2e8   :  { %1421 = vsyncadd [#allocation3], 4294967040 }
 0x2e9   :  { %1370 = vsyncpa [#allocation3], 1 }

</bundles_post_ra>
